<compile_context>
chip_gen: v7x
topology: tpu7x:2x2x1
jax: 0.10.0
libtpu: 0.0.40
codegen_flags: <defaults>
</compile_context>

<pallas_src>
import functools

import jax
import jax.numpy as jnp
from jax.experimental import pallas as pl
from jax.experimental.pallas import tpu as pltpu


def _mlp_kernel(x_ref, w1_ref, b1_ref, w2_ref, b2_ref, w3_ref, b3_ref, o_ref):
    x = x_ref[...]                                      # (D_in, block_b) bf16

    # fc1 + ReLU : (H1, D_in) @ (D_in, B) -> (H1, B), f32 accumulation on MXU
    h1 = jnp.dot(w1_ref[...], x, preferred_element_type=jnp.float32)
    h1 = jnp.maximum(h1 + b1_ref[...], 0.0)             # (H1, block_b) f32

    # fc2 + ReLU : (H2, H1) @ (H1, B) -> (H2, B), f32 accumulation on MXU
    h2 = jnp.dot(w2_ref[...], h1.astype(jnp.bfloat16),
                 preferred_element_type=jnp.float32)
    h2 = jnp.maximum(h2 + b2_ref[...], 0.0)             # (H2, block_b) f32

    # fc3 + sigmoid on VPU/XLU (avoid an N=1 MXU matmul): broadcast the
    # (H2, 1) weight column along lanes, reduce across sublanes.
    logits = jnp.sum(h2 * w3_ref[...], axis=0, keepdims=True) + b3_ref[...]
    o_ref[...] = jax.nn.sigmoid(logits).astype(o_ref.dtype)   # (1, block_b)


@functools.partial(jax.jit, static_argnames=("block_b",))
def mlp_elec2_forward(x, params, *, block_b=512):
    """x: (B, input_size) float32 -> (B, 1) float32."""
    w1, b1, w2, b2, w3, b3 = params
    B, D_in = x.shape
    H1 = w1.shape[0]          # 128
    H2 = w2.shape[0]          # 128

    block_b = min(block_b, B)
    grid = (pl.cdiv(B, block_b),)

    # One-time layout plumbing outside the hot loop: batch onto the lane axis,
    # bf16 for the MXU operands (x is the only O(B) input stream).
    x_t = x.T.astype(jnp.bfloat16)            # (D_in, B)
    w1b = w1.astype(jnp.bfloat16)             # (H1, D_in)
    w2b = w2.astype(jnp.bfloat16)             # (H2, H1)

    out_t = pl.pallas_call(
        _mlp_kernel,
        out_shape=jax.ShapeDtypeStruct((1, B), jnp.float32),
        grid_spec=pltpu.PrefetchScalarGridSpec(
            num_scalar_prefetch=0,
            grid=grid,
            in_specs=[
                # batch-tiled, transposed activations (the streaming input)
                pl.BlockSpec((D_in, block_b), lambda i: (0, i)),
                # weights / biases: constant index_map -> VMEM-resident,
                # Pallas skips the re-DMA across grid steps.
                pl.BlockSpec((H1, D_in), lambda i: (0, 0)),
                pl.BlockSpec((H1, 1), lambda i: (0, 0)),
                pl.BlockSpec((H2, H1), lambda i: (0, 0)),
                pl.BlockSpec((H2, 1), lambda i: (0, 0)),
                pl.BlockSpec((H2, 1), lambda i: (0, 0)),
                pl.BlockSpec((1, 1), lambda i: (0, 0)),
            ],
            # lane-dense output: block_b lanes per store
            out_specs=pl.BlockSpec((1, block_b), lambda i: (0, i)),
        ),
        compiler_params=pltpu.CompilerParams(
            dimension_semantics=("parallel",)
        ),
    )(x_t, w1b, b1, w2b, b2, w3, b3)

    return out_t.reshape(B, 1)


def init_params(key, input_size):
    """Deterministic synthetic params matching MLP_Elec2's shapes.

    Weights are kept in the native PyTorch (out_features, in_features) layout;
    fc3's weight is stored as a (128, 1) column (its transpose) and biases as
    column vectors so the transposed-activation kernel broadcasts them directly.
    """
    k1, k2, k3, k4, k5, k6 = jax.random.split(key, 6)
    w1 = jax.random.normal(k1, (128, input_size), jnp.float32) * 0.1   # (out, in)
    b1 = jax.random.normal(k2, (128, 1), jnp.float32) * 0.1
    w2 = jax.random.normal(k3, (128, 128), jnp.float32) * 0.1          # (out, in)
    b2 = jax.random.normal(k4, (128, 1), jnp.float32) * 0.1
    w3 = jax.random.normal(k5, (128, 1), jnp.float32) * 0.1            # fc3 weight^T
    b3 = jax.random.normal(k6, (1, 1), jnp.float32) * 0.1
    return (w1, b1, w2, b2, w3, b3)


def reference_forward(x, params):
    """Pure-JAX f32 reference matching the PyTorch forward."""
    w1, b1, w2, b2, w3, b3 = params
    h = jnp.maximum(x @ w1.T + b1.T, 0.0)
    h = jnp.maximum(h @ w2.T + b2.T, 0.0)
    return jax.nn.sigmoid(h @ w3 + b3.T)


def reference_forward_bf16(x, params):
    """Reference using the same bf16-operand / f32-accumulate recipe as the kernel."""
    w1, b1, w2, b2, w3, b3 = params
    h = jnp.dot(x.astype(jnp.bfloat16), w1.T.astype(jnp.bfloat16),
                preferred_element_type=jnp.float32) + b1.T
    h = jnp.maximum(h, 0.0)
    h = jnp.dot(h.astype(jnp.bfloat16), w2.T.astype(jnp.bfloat16),
                preferred_element_type=jnp.float32) + b2.T
    h = jnp.maximum(h, 0.0)
    return jax.nn.sigmoid(h @ w3 + b3.T)


if __name__ == "__main__":
    key = jax.random.PRNGKey(0)
    k_x, k_p = jax.random.split(key)

    batch = 1024          # multiple of block_b -> grid of 2 (feeds both v7x TCs)
    input_size = 8        # Elec2-style small feature vector
    block_b = 512

    x = jax.random.normal(k_x, (batch, input_size), jnp.float32)
    params = init_params(k_p, input_size)

    out = mlp_elec2_forward(x, params, block_b=block_b)
    out = jax.block_until_ready(out)

    assert out.shape == (batch, 1), out.shape

    ref_bf16 = reference_forward_bf16(x, params)   # same rounding recipe -> tight
    ref_f32 = reference_forward(x, params)         # pure f32 semantics -> loose
    assert jnp.allclose(out, ref_bf16, atol=5e-3, rtol=5e-3), \
        float(jnp.max(jnp.abs(out - ref_bf16)))
    assert jnp.allclose(out, ref_f32, atol=3e-2, rtol=3e-2), \
        float(jnp.max(jnp.abs(out - ref_f32)))

    print("KERNEL_OK")
</pallas_src>

<mosaic_0001>
module attributes {stable_mosaic.version = 11 : i64} {
  func.func @_mlp_kernel(%arg0: i32, %arg1: memref<8x512xbf16, #tpu.memory_space<vmem>>, %arg2: memref<128x8xbf16, #tpu.memory_space<vmem>>, %arg3: memref<128x1xf32, #tpu.memory_space<vmem>>, %arg4: memref<128x128xbf16, #tpu.memory_space<vmem>>, %arg5: memref<128x1xf32, #tpu.memory_space<vmem>>, %arg6: memref<128x1xf32, #tpu.memory_space<vmem>>, %arg7: memref<1x1xf32, #tpu.memory_space<vmem>>, %arg8: memref<1x512xf32, #tpu.memory_space<vmem>>) attributes {dimension_semantics = [#tpu.dimension_semantics<parallel>], iteration_bounds = array<i64: 2>, scalar_prefetch = 0 : i64, scratch_operands = 0 : i64, tpu.core_type = #tpu.core_type<tc>, window_params = [{transform_indices = @transform_0, window_bounds = array<i64: 8, 512>}, {pipeline_mode = #tpu.pipeline_mode<synchronous>, transform_indices = @transform_1, window_bounds = array<i64: 128, 8>}, {pipeline_mode = #tpu.pipeline_mode<synchronous>, transform_indices = @transform_2, window_bounds = array<i64: 128, 1>}, {pipeline_mode = #tpu.pipeline_mode<synchronous>, transform_indices = @transform_3, window_bounds = array<i64: 128, 128>}, {pipeline_mode = #tpu.pipeline_mode<synchronous>, transform_indices = @transform_4, window_bounds = array<i64: 128, 1>}, {pipeline_mode = #tpu.pipeline_mode<synchronous>, transform_indices = @transform_5, window_bounds = array<i64: 128, 1>}, {pipeline_mode = #tpu.pipeline_mode<synchronous>, transform_indices = @transform_6, window_bounds = array<i64: 1, 1>}, {transform_indices = @transform_7, window_bounds = array<i64: 1, 512>}]} {
    %c0 = arith.constant 0 : index
    %c0_0 = arith.constant 0 : index
    %0 = vector.load %arg1[%c0, %c0_0] : memref<8x512xbf16, #tpu.memory_space<vmem>>, vector<8x512xbf16>
    %c0_1 = arith.constant 0 : index
    %c0_2 = arith.constant 0 : index
    %1 = vector.load %arg2[%c0_1, %c0_2] : memref<128x8xbf16, #tpu.memory_space<vmem>>, vector<128x8xbf16>
    %cst = arith.constant dense<0.000000e+00> : vector<128x512xf32>
    %2 = tpu.matmul %1, %0, %cst {dimension_numbers = #tpu.dot_dimension_numbers<[1], [0], [0], [1], [0, 0, 1, 1], [], []>} : vector<128x8xbf16>, vector<8x512xbf16>, vector<128x512xf32> -> vector<128x512xf32>
    %c0_3 = arith.constant 0 : index
    %c0_4 = arith.constant 0 : index
    %3 = vector.load %arg3[%c0_3, %c0_4] : memref<128x1xf32, #tpu.memory_space<vmem>>, vector<128x1xf32>
    %4 = vector.broadcast %3 : vector<128x1xf32> to vector<128x512xf32>
    %5 = arith.addf %2, %4 : vector<128x512xf32>
    %cst_5 = arith.constant 0.000000e+00 : f32
    %6 = vector.broadcast %cst_5 : f32 to vector<128x512xf32>
    %7 = arith.maximumf %5, %6 : vector<128x512xf32>
    %c0_6 = arith.constant 0 : index
    %c0_7 = arith.constant 0 : index
    %8 = vector.load %arg4[%c0_6, %c0_7] : memref<128x128xbf16, #tpu.memory_space<vmem>>, vector<128x128xbf16>
    %9 = arith.truncf %7 : vector<128x512xf32> to vector<128x512xbf16>
    %cst_8 = arith.constant dense<0.000000e+00> : vector<128x512xf32>
    %10 = tpu.matmul %8, %9, %cst_8 {dimension_numbers = #tpu.dot_dimension_numbers<[1], [0], [0], [1], [0, 0, 1, 1], [], []>} : vector<128x128xbf16>, vector<128x512xbf16>, vector<128x512xf32> -> vector<128x512xf32>
    %c0_9 = arith.constant 0 : index
    %c0_10 = arith.constant 0 : index
    %11 = vector.load %arg5[%c0_9, %c0_10] : memref<128x1xf32, #tpu.memory_space<vmem>>, vector<128x1xf32>
    %12 = vector.broadcast %11 : vector<128x1xf32> to vector<128x512xf32>
    %13 = arith.addf %10, %12 : vector<128x512xf32>
    %cst_11 = arith.constant 0.000000e+00 : f32
    %14 = vector.broadcast %cst_11 : f32 to vector<128x512xf32>
    %15 = arith.maximumf %13, %14 : vector<128x512xf32>
    %c0_12 = arith.constant 0 : index
    %c0_13 = arith.constant 0 : index
    %16 = vector.load %arg6[%c0_12, %c0_13] : memref<128x1xf32, #tpu.memory_space<vmem>>, vector<128x1xf32>
    %17 = vector.broadcast %16 : vector<128x1xf32> to vector<128x512xf32>
    %18 = arith.mulf %15, %17 : vector<128x512xf32>
    %cst_14 = arith.constant dense<0.000000e+00> : vector<512xf32>
    %19 = vector.multi_reduction <add>, %18, %cst_14 [0] : vector<128x512xf32> to vector<512xf32>
    %20 = vector.shape_cast %19 : vector<512xf32> to vector<1x512xf32>
    %c0_15 = arith.constant 0 : index
    %c0_16 = arith.constant 0 : index
    %21 = vector.load %arg7[%c0_15, %c0_16] : memref<1x1xf32, #tpu.memory_space<vmem>>, vector<1x1xf32>
    %22 = vector.broadcast %21 : vector<1x1xf32> to vector<1x512xf32>
    %23 = arith.addf %20, %22 : vector<1x512xf32>
    %24 = arith.negf %23 : vector<1x512xf32>
    %25 = math.exp %24 : vector<1x512xf32>
    %cst_17 = arith.constant 1.000000e+00 : f32
    %26 = vector.broadcast %cst_17 : f32 to vector<1x512xf32>
    %27 = arith.addf %26, %25 : vector<1x512xf32>
    %28 = arith.divf %26, %27 : vector<1x512xf32>
    %c0_18 = arith.constant 0 : index
    %c0_19 = arith.constant 0 : index
    %29 = vector.load %arg8[%c0_18, %c0_19] : memref<1x512xf32, #tpu.memory_space<vmem>>, vector<1x512xf32>
    tpu.vector_store %arg8[%c0_18, %c0_19], %28 {strides = array<i32>} : memref<1x512xf32, #tpu.memory_space<vmem>>, vector<1x512xf32>,
    return
  }
  func.func @transform_0(%arg0: i32) -> (i32, i32) {
    %c0_i32 = arith.constant 0 : i32
    %c0_i32_0 = arith.constant 0 : i32
    return %c0_i32, %arg0 : i32, i32
  }
  func.func @transform_1(%arg0: i32) -> (i32, i32) {
    %c0_i32 = arith.constant 0 : i32
    %c0_i32_0 = arith.constant 0 : i32
    %c0_i32_1 = arith.constant 0 : i32
    return %c0_i32, %c0_i32_0 : i32, i32
  }
  func.func @transform_2(%arg0: i32) -> (i32, i32) {
    %c0_i32 = arith.constant 0 : i32
    %c0_i32_0 = arith.constant 0 : i32
    %c0_i32_1 = arith.constant 0 : i32
    return %c0_i32, %c0_i32_0 : i32, i32
  }
  func.func @transform_3(%arg0: i32) -> (i32, i32) {
    %c0_i32 = arith.constant 0 : i32
    %c0_i32_0 = arith.constant 0 : i32
    %c0_i32_1 = arith.constant 0 : i32
    return %c0_i32, %c0_i32_0 : i32, i32
  }
  func.func @transform_4(%arg0: i32) -> (i32, i32) {
    %c0_i32 = arith.constant 0 : i32
    %c0_i32_0 = arith.constant 0 : i32
    %c0_i32_1 = arith.constant 0 : i32
    return %c0_i32, %c0_i32_0 : i32, i32
  }
  func.func @transform_5(%arg0: i32) -> (i32, i32) {
    %c0_i32 = arith.constant 0 : i32
    %c0_i32_0 = arith.constant 0 : i32
    %c0_i32_1 = arith.constant 0 : i32
    return %c0_i32, %c0_i32_0 : i32, i32
  }
  func.func @transform_6(%arg0: i32) -> (i32, i32) {
    %c0_i32 = arith.constant 0 : i32
    %c0_i32_0 = arith.constant 0 : i32
    %c0_i32_1 = arith.constant 0 : i32
    return %c0_i32, %c0_i32_0 : i32, i32
  }
  func.func @transform_7(%arg0: i32) -> (i32, i32) {
    %c0_i32 = arith.constant 0 : i32
    %c0_i32_0 = arith.constant 0 : i32
    return %c0_i32, %arg0 : i32, i32
  }
}

</mosaic_0001>

<bundles_post_ra>
// kernel: mlp_elec2_forward.1
= control target key start
LH: loop header
LB: loop body
LE: loop exit
PB: predicated region body
PF: predicated region fallthrough
CT: control target
= control target key end

     0   :  { %s2360_s0 = inlined_call_operand.vmem [shape: bf16[8,1024], index: 0, kind: input, shape index: {}]   ;;  %s2361_s1 = inlined_call_operand.vmem [shape: bf16[128,8], index: 1, kind: input, shape index: {}]   ;;  %s2362_s2 = inlined_call_operand.vmem [shape: f32[128,1], index: 2, kind: input, shape index: {}]   ;;  %s2363_s3 = inlined_call_operand.vmem [shape: bf16[128,128], index: 3, kind: input, shape index: {}]   ;;  %s2364_s4 = inlined_call_operand.vmem [shape: f32[128,1], index: 4, kind: input, shape index: {}]   ;;  %s2365_s5 = inlined_call_operand.vmem [shape: f32[128,1], index: 5, kind: input, shape index: {}]   ;;  %s2366_s6 = inlined_call_operand.<no memory space> [shape: f32[1,1], index: 6, kind: input, shape index: {}]   ;;  %s2367_s7 = inlined_call_operand.hbm [shape: f32[1,1024], index: 7, kind: output, shape index: {}]  }
   0x1   :  { %v12_v0 = vstv %s2366_s6 }
   0x2   :  { %13 = vst [vmem:[#allocation2] sm:$0x1] %v12_v0 }
   0x3   :  { %14 = vsyncpa [#allocation4], 0 }
   0x4   :  { %16 = vsyncpa [#allocation4 + $0x1], 0  ;;  %s1891_s26 = smov 0   ;;  %s1893_s27 = smov 0  }
   0x5   :  { %s1895_s28 = smov 0   ;;  %s1897_s29 = smov 0  }
   0x6 LB: > { %s1912_s6 = sadd.s32 4294967295, %s1843_s29   ;;  %s1647_s30 = sadd.s32 4294967294, %s1843_s29   ;;  %s1843_s29 = sphi %s1897_s29, %s2373_s29   ;;  %s1839_s28 = sphi %s1895_s28, %s2372_s28   ;;  %s1835_s27 = sphi %s1893_s27, %s2371_s27   ;;  %s1831_s26 = sphi %s1891_s26, %s2370_s26  }
   0x7   : > { %s1916_s8 = sadd.s32 1, %s1843_s29   ;;  %s181_s9 = sadd.s32 1, %s1839_s28 }
   0x8   : > { %s178_s10 = ssub.s32 %s1843_s29, %s1916_s8  ;;  %p191_p0 = scmp.ne.s32.totalorder %s1839_s28, %s1835_s27 }
   0x9   : > { %p179_p1 = scmp.eq.s32.totalorder %s178_s10, 0  ;;  %p192_p2 = scmp.eq.s32.totalorder %s1912_s6, 1 }
   0xa   : > { %p197_p3 = scmp.ne.s32.totalorder %s1835_s27, %s1831_s26  ;;  %p198_p4 = scmp.eq.s32.totalorder %s1647_s30, 1 }
   0xb   : > { %s1927_s11 = scalar_select %p179_p1, %s1839_s28, %s181_s9  }
   0xc   : > { %p1929_p5 = por %p192_p2, %p191_p0  ;;  %p1933_p6 = por %p198_p4, %p197_p3 }
   0xd   : > { %p1650_p7 = scmp.ge.s32.totalorder %s1843_s29, 1  ;;  %p243_p8 = scmp.lt.s32.totalorder %s1843_s29, 3 }
   0xf   : > { %p244_p9 = pnand %p1650_p7, %p243_p8 }
  0x10   : > { %v301_v1 = vld [vmem:[%s2362_s2] sm:$0xff] (!%p244_p9)  ;;  %s1652_s16 = sshll.u32 (!%p244_p9), %s1912_s6, 2  ;;  %v1845_v2 = vmov (!%p244_p9), 0   ;;  %v303_v3 = vld [vmem:[%s2362_s2 + $0x10] sm:$0xff] (!%p244_p9)  ;;  %v302_v4 = vld [vmem:[%s2362_s2 + $0x8] sm:$0xff] (!%p244_p9)  ;;  %vm472_vm0 = vcmask (!%p244_p9), 1043456  }
  0x11   : > { %247 = sbr.rel (%p244_p9) target bundleno = 658 (0x292), region = 48  ;;  %1743 = vset.pattern.permute.xlu0 (!%p244_p9), %v1845_v2  ;;  %p276_p10 = scmp.lt.s32.totalorder (!%p244_p9), %s1652_s16, 7  ;;  %1744 = vset.pattern.permute.xlu1 (!%p244_p9), %v1845_v2  ;;  %v304_v5 = vld [vmem:[%s2362_s2 + $0x18] sm:$0xff] (!%p244_p9)  ;;  %v305_v6 = vld [vmem:[%s2362_s2 + $0x20] sm:$0xff] (!%p244_p9)  ;;  %v306_v13 = vld [vmem:[%s2362_s2 + $0x28] sm:$0xff] (!%p244_p9)  ;;  %vm447_vm1 = vcmask (!%p244_p9), 64512  }
  0x12   : > { %319 = vperm.xlu0 (!%p244_p9), %1743, %v301_v1   ;;  %517 = vmatprep.mubr.bf16.mxu0 (!%p244_p9), %v1845_v2  ;;  %v1749_v16 = vld [vmem:[%s2361_s1] sm:$0xff] (!%p244_p9)   ;;  %v307_v17 = vld [vmem:[%s2362_s2 + $0x30] sm:$0xff] (!%p244_p9)  ;;  %v308_v18 = vld [vmem:[%s2362_s2 + $0x38] sm:$0xff] (!%p244_p9)  ;;  %s272_s9 = sand.u32 (!%p244_p9), 1, %s1835_s27   ;;  %s1701_s14 = sshll.u32 (!%p244_p9), %s1912_s6, 6 }
  0x13   : > { %630 = vmatprep.mubr.bf16.mxu1 (!%p244_p9), %v1845_v2  ;;  %329 = vperm.xlu1 (!%p244_p9), %1744, %v303_v3   ;;  %v309_v19 = vld [vmem:[%s2362_s2 + $0x40] sm:$0xff] (!%p244_p9)  ;;  %v310_v20 = vld [vmem:[%s2362_s2 + $0x48] sm:$0xff] (!%p244_p9)  ;;  %v311_v22 = vld [vmem:[%s2362_s2 + $0x50] sm:$0xff] (!%p244_p9)  ;;  %s1651_s10 = sshll.u32 (!%p244_p9), %s272_s9, 2  ;;  %s2318_s19 = scalar_lea.hbm (!%p244_p9), %s2367_s7, %s1701_s14 }
  0x14   : > { %v1750_v21 = vld [vmem:[%s2361_s1 + $0x8] sm:$0xff] (!%p244_p9)   ;;  %v312_v23 = vld [vmem:[%s2362_s2 + $0x58] sm:$0xff] (!%p244_p9)  ;;  %v313_v24 = vld [vmem:[%s2362_s2 + $0x60] sm:$0xff] (!%p244_p9)  ;;  %s274_s15 = scalar_lea.vmem (!%p244_p9), [#allocation3], %s1651_s10  ;;  %s1574_s20 = scalar_lea.sflag (!%p244_p9), [#allocation4], %s272_s9 }
  0x15   : > { %v1751_v25 = vld [vmem:[%s2361_s1 + $0x10] sm:$0xff] (!%p244_p9)   ;;  %v314_v26 = vld [vmem:[%s2362_s2 + $0x68] sm:$0xff] (!%p244_p9)  ;;  %v316_v28 = vld [vmem:[%s2362_s2 + $0x78] sm:$0xff] (!%p244_p9)  ;;  %s1847_s6 = smov (!%p244_p9), [#allocation3]  }
  0x16   : > { %324 = vperm.xlu0 (!%p244_p9), %1743, %v302_v4   ;;  %v315_v27 = vld [vmem:[%s2362_s2 + $0x70] sm:$0xff] (!%p244_p9)  ;;  %v823_v29 = vld [vmem:[%s2364_s4] sm:$0xff] (!%p244_p9)  ;;  %v824_v30 = vld [vmem:[%s2364_s4 + $0x8] sm:$0xff] (!%p244_p9)  ;;  %s1785_s22 = sshll.u32 (!%p244_p9), %s1847_s6, 4  ;;  %s1786_s22 = int_to_ptr.vmem [resolvable:$false] %s1785_s22 }
  0x17   : > { %334 = vperm.xlu1 (!%p244_p9), %1744, %v304_v5   ;;  %v1752_v31 = vld [vmem:[%s2361_s1 + $0x18] sm:$0xff] (!%p244_p9)   ;;  %v825_v32 = vld [vmem:[%s2364_s4 + $0x10] sm:$0xff] (!%p244_p9)  ;;  %v1257_v34 = vld [vmem:[%s2365_s5] sm:$0xff] (!%p244_p9) }
  0x18   : > { %s2375_s16 = smov (!%p276_p10, %s1652_s16), 7  ;;  %v826_v33 = vld [vmem:[%s2364_s4 + $0x18] sm:$0xff]  ;;  %v1258_v35 = vld [vmem:[%s2365_s5 + $0x8] sm:$0xff]  ;;  %v1753_v36 = vld [vmem:[%s2361_s1 + $0x20] sm:$0xff]  }
  0x19   : > { %s1653_s23 = sshll.u32 %s2375_s16, 2  ;;  %v827_v37 = vld [vmem:[%s2364_s4 + $0x20] sm:$0xff]  ;;  %v1259_v38 = vld [vmem:[%s2365_s5 + $0x10] sm:$0xff]  ;;  %v828_v39 = vld [vmem:[%s2364_s4 + $0x28] sm:$0xff]  ;;  %s1588_s16 = sshll.u32 %s274_s15, 4  ;;  %s2320_s16 = int_to_ptr.vmem [resolvable:$true] %s1588_s16 }
  0x1a   : > { %s279_s30 = scalar_lea.vmem %s2360_s0, %s1653_s23  ;;  %339 = vperm.xlu0 %1743, %v305_v6   ;;  %v1260_v40 = vld [vmem:[%s2365_s5 + $0x18] sm:$0xff]  ;;  %v1754_v41 = vld [vmem:[%s2361_s1 + $0x28] sm:$0xff]   ;;  %v829_v42 = vld [vmem:[%s2364_s4 + $0x30] sm:$0xff]  ;;  %s1781_s21 = scalar_lea.vmem %s2320_s16, 64 }
  0x1b   : > { %v283_v7 = vld [vmem:[%s279_s30] sm:$0xff]  ;;  %v284_v8 = vld [vmem:[%s279_s30 + $0x8] sm:$0xff]  ;;  %344 = vperm.xlu1 %1744, %v306_v13   ;;  %v830_v44 = vld [vmem:[%s2364_s4 + $0x38] sm:$0xff]  ;;  %p1782_p11 = scmp.ne.s32.totalorder %s2320_s16, %s1781_s21  ;;  %s1787_s23 = scalar_lea.vmem %s1786_s22, 128 }
  0x1c   : > { %v1663_v9 = vcombine.high %v283_v7, %v283_v7  ;;  %v1665_v10 = vcombine.high %v284_v8, %v284_v8  ;;  %v1662_v11 = vcombine.low %v283_v7, %v283_v7  ;;  %v1664_v12 = vcombine.low %v284_v8, %v284_v8  ;;  %v1261_v43 = vld [vmem:[%s2365_s5 + $0x20] sm:$0xff]  ;;  %v1262_v45 = vld [vmem:[%s2365_s5 + $0x28] sm:$0xff]  ;;  %v1755_v46 = vld [vmem:[%s2361_s1 + $0x30] sm:$0xff]   ;;  %p1788_p0 = scmp.lt.s32.totalorder %s2320_s16, %s1786_s22  ;;  %p1789_p1 = scmp.lt.s32.totalorder %s1787_s23, %s1781_s21 }
  0x1d   : > { %v831_v47 = vld [vmem:[%s2364_s4 + $0x40] sm:$0xff]  ;;  %v1263_v48 = vld [vmem:[%s2365_s5 + $0x30] sm:$0xff]  ;;  %v832_v49 = vld [vmem:[%s2364_s4 + $0x48] sm:$0xff]  ;;  %p1783_p12 = pnand %p1782_p11, %p1929_p5 }
  0x1e   : > { %1666 = vmatprep.subr.msk.bf16.mxu0 %vm472_vm0, %v1663_v9  ;;  %v474_v14 = vsel %vm472_vm0, %v1662_v11, 0  ;;  %v480_v15 = vsel %vm472_vm0, %v1664_v12, 0  ;;  %1675 = vmatprep.subr.msk.bf16.mxu1 %vm472_vm0, %v1665_v10  ;;  %v1264_v50 = vld [vmem:[%s2365_s5 + $0x38] sm:$0xff]  ;;  %v833_v52 = vld [vmem:[%s2364_s4 + $0x50] sm:$0xff]  ;;  %v1265_v53 = vld [vmem:[%s2365_s5 + $0x40] sm:$0xff]  ;;  %p1790_p2 = por %p1789_p1, %p1788_p0 }
  0x1f   : > { %486 = vmatpush1.bf16.msra.mxu0 %v474_v14  ;;  %599 = vmatpush1.bf16.msra.mxu1 %v480_v15  ;;  %v1756_v51 = vld [vmem:[%s2361_s1 + $0x38] sm:$0xff]   ;;  %v1266_v55 = vld [vmem:[%s2365_s5 + $0x48] sm:$0xff]  ;;  %v835_v56 = vld [vmem:[%s2364_s4 + $0x60] sm:$0xff]  ;;  %p1784_p13 = pneg %p1783_p12 }
  0x20   : > { %349 = vperm.xlu0 %1743, %v307_v17   ;;  %354 = vperm.xlu1 %1744, %v308_v18   ;;  %v834_v54 = vld [vmem:[%s2364_s4 + $0x58] sm:$0xff]  ;;  %v1267_v57 = vld [vmem:[%s2365_s5 + $0x50] sm:$0xff]  ;;  %v836_v58 = vld [vmem:[%s2364_s4 + $0x68] sm:$0xff] }
  0x21   : > { %v1268_v59 = vld [vmem:[%s2365_s5 + $0x58] sm:$0xff]  ;;  %v837_v60 = vld [vmem:[%s2364_s4 + $0x70] sm:$0xff]  ;;  %v1269_v61 = vld [vmem:[%s2365_s5 + $0x60] sm:$0xff]  ;;  %p1791_p3 = pnand %p1790_p2, %p1784_p13 }
  0x22   : > { %1667 = vmatmul.mubr.msk.bf16.vlgmr.msra.gmra.mrb[0].mxu0 %vm447_vm1, %v1749_v16  ;;  %1676 = vmatmul.mubr.msk.bf16.vlgmr.msra.gmra.mrb[0].mxu1 %vm447_vm1, %v1749_v16  ;;  %v838_v62 = vld [vmem:[%s2364_s4 + $0x78] sm:$0xff]  ;;  %v1270_v63 = vld [vmem:[%s2365_s5 + $0x68] sm:$0xff]  ;;  %v1271_v0 = vld [vmem:[%s2365_s5 + $0x70] sm:$0xff] }
  0x23   : > { %527 = vmatprep.mubr.bf16.mxu0 %v1845_v2  ;;  %640 = vmatprep.mubr.bf16.mxu1 %v1845_v2  ;;  %v1272_v1 = vld [vmem:[%s2365_s5 + $0x78] sm:$0xff]  ;;  %v1501_v3 = vld [vmem:[#allocation2] sm:$0x1] }
  0x24   : > { %359 = vperm.xlu0 %1743, %v309_v19   ;;  %364 = vperm.xlu1 %1744, %v310_v20  }
  0x28   : > { %369 = vperm.xlu0 %1743, %v311_v22   ;;  %374 = vperm.xlu1 %1744, %v312_v23  }
  0x2a   : > { %1668 = vmatmul.mubr.msk.bf16.gmra.mrb[4].mxu0 %vm447_vm1, %v1750_v21  ;;  %1677 = vmatmul.mubr.msk.bf16.gmra.mrb[4].mxu1 %vm447_vm1, %v1750_v21 }
  0x2b   : > { %537 = vmatprep.mubr.bf16.mxu0 %v1845_v2  ;;  %650 = vmatprep.mubr.bf16.mxu1 %v1845_v2 }
  0x2c   : > { %379 = vperm.xlu0 %1743, %v313_v24   ;;  %384 = vperm.xlu1 %1744, %v314_v26  }
  0x30   : > { %389 = vperm.xlu0 %1743, %v315_v27   ;;  %394 = vperm.xlu1 %1744, %v316_v28  }
  0x32   : > { %1669 = vmatmul.mubr.msk.bf16.gmra.mrb[8].mxu0 %vm447_vm1, %v1751_v25  ;;  %1678 = vmatmul.mubr.msk.bf16.gmra.mrb[8].mxu1 %vm447_vm1, %v1751_v25 }
  0x33   : > { %547 = vmatprep.mubr.bf16.mxu0 %v1845_v2  ;;  %660 = vmatprep.mubr.bf16.mxu1 %v1845_v2 }
  0x34   : > { %841 = vperm.xlu0 %1743, %v823_v29   ;;  %846 = vperm.xlu1 %1744, %v824_v30  }
  0x38   : > { %851 = vperm.xlu0 %1743, %v825_v32   ;;  %856 = vperm.xlu1 %1744, %v826_v33  }
  0x3a   : > { %1670 = vmatmul.mubr.msk.bf16.gmra.mrb[12].mxu0 %vm447_vm1, %v1752_v31  ;;  %1679 = vmatmul.mubr.msk.bf16.gmra.mrb[12].mxu1 %vm447_vm1, %v1752_v31 }
  0x3b   : > { %557 = vmatprep.mubr.bf16.mxu0 %v1845_v2  ;;  %670 = vmatprep.mubr.bf16.mxu1 %v1845_v2 }
  0x3c   : > { %1275 = vperm.xlu0 %1743, %v1257_v34   ;;  %1280 = vperm.xlu1 %1744, %v1258_v35  }
  0x40   : > { %861 = vperm.xlu0 %1743, %v827_v37   ;;  %1285 = vperm.xlu1 %1744, %v1259_v38  }
  0x42   : > { %1671 = vmatmul.mubr.msk.bf16.gmra.mrb[16].mxu0 %vm447_vm1, %v1753_v36  ;;  %1680 = vmatmul.mubr.msk.bf16.gmra.mrb[16].mxu1 %vm447_vm1, %v1753_v36 }
  0x43   : > { %567 = vmatprep.mubr.bf16.mxu0 %v1845_v2  ;;  %680 = vmatprep.mubr.bf16.mxu1 %v1845_v2 }
  0x44   : > { %866 = vperm.xlu0 %1743, %v828_v39   ;;  %1290 = vperm.xlu1 %1744, %v1260_v40  }
  0x48   : > { %871 = vperm.xlu0 %1743, %v829_v42   ;;  %1295 = vperm.xlu1 %1744, %v1261_v43  }
  0x4a   : > { %1672 = vmatmul.mubr.msk.bf16.gmra.mrb[20].mxu0 %vm447_vm1, %v1754_v41  ;;  %1681 = vmatmul.mubr.msk.bf16.gmra.mrb[20].mxu1 %vm447_vm1, %v1754_v41 }
  0x4b   : > { %577 = vmatprep.mubr.bf16.mxu0 %v1845_v2  ;;  %690 = vmatprep.mubr.bf16.mxu1 %v1845_v2 }
  0x4c   : > { %876 = vperm.xlu0 %1743, %v830_v44   ;;  %1300 = vperm.xlu1 %1744, %v1262_v45  }
  0x50   : > { %881 = vperm.xlu0 %1743, %v831_v47   ;;  %1305 = vperm.xlu1 %1744, %v1263_v48  }
  0x52   : > { %1673 = vmatmul.mubr.msk.bf16.gmra.mrb[24].mxu0 %vm447_vm1, %v1755_v46  ;;  %1682 = vmatmul.mubr.msk.bf16.gmra.mrb[24].mxu1 %vm447_vm1, %v1755_v46 }
  0x53   : > { %587 = vmatprep.mubr.bf16.mxu0 %v1845_v2  ;;  %700 = vmatprep.mubr.bf16.mxu1 %v1845_v2 }
  0x54   : > { %886 = vperm.xlu0 %1743, %v832_v49   ;;  %1310 = vperm.xlu1 %1744, %v1264_v50  }
  0x58   : > { %891 = vperm.xlu0 %1743, %v833_v52   ;;  %1315 = vperm.xlu1 %1744, %v1265_v53  }
  0x5a   : > { %1674 = vmatmul.mubr.msk.bf16.gmra.mrb[28].mxu0 %vm447_vm1, %v1756_v51  ;;  %1683 = vmatmul.mubr.msk.bf16.gmra.mrb[28].mxu1 %vm447_vm1, %v1756_v51 }
  0x5b   : > { %999 = vmatprep.mubr.bf16.mxu0 %v1845_v2  ;;  %1112 = vmatprep.mubr.bf16.mxu1 %v1845_v2 }
  0x5c   : > { %896 = vperm.xlu0 %1743, %v834_v54   ;;  %1320 = vperm.xlu1 %1744, %v1266_v55  }
  0x60   : > { %901 = vperm.xlu0 %1743, %v835_v56   ;;  %1325 = vperm.xlu1 %1744, %v1267_v57  }
  0x64   : > { %906 = vperm.xlu0 %1743, %v836_v58   ;;  %1330 = vperm.xlu1 %1744, %v1268_v59  }
  0x68   : > { %911 = vperm.xlu0 %1743, %v837_v60   ;;  %1335 = vperm.xlu1 %1744, %v1269_v61  }
  0x6c   : > { %916 = vperm.xlu0 %1743, %v838_v62   ;;  %1340 = vperm.xlu1 %1744, %v1270_v63  }
  0x70   : > { %1345 = vperm.xlu0 %1743, %v1271_v0   ;;  %1350 = vperm.xlu1 %1744, %v1272_v1  }
  0x74   : > { %1504 = vperm.xlu0 %1743, %v1501_v3  }
  0x91   : > { %v320_v4 = vpop.permute.xlu0 %319 }
  0x92   : > { %v330_v5 = vpop.permute.xlu1 %329 }
  0x95   : > { %v325_v6 = vpop.permute.xlu0 %324 }
  0x96   : > { %v335_v32 = vpop.permute.xlu1 %334 }
  0x99   : > { %v340_v58 = vpop.permute.xlu0 %339 }
  0x9a   : > { %v345_v62 = vpop.permute.xlu1 %344 }
  0xf5   : > { %v519_v7 = vpop.f32.mrb[0].mxu0  ;;  %v632_v9 = vpop.f32.mrb[0].mxu1 }
  0xf6   : > { %v520_v8 = vadd.f32 %v519_v7, %v320_v4  ;;  %v521_v10 = vpop.f32.mrb[1].mxu0  ;;  %v633_v11 = vadd.f32 %v632_v9, %v320_v4  ;;  %v634_v13 = vpop.f32.mrb[1].mxu1 }
  0xf7   : > { %v522_v12 = vadd.f32 %v521_v10, %v320_v4  ;;  %v523_v14 = vpop.f32.mrb[2].mxu0  ;;  %v635_v15 = vadd.f32 %v634_v13, %v320_v4  ;;  %v636_v17 = vpop.f32.mrb[2].mxu1 }
  0xf8   : > { %v524_v16 = vadd.f32 %v523_v14, %v325_v6  ;;  %v525_v18 = vpop.f32.mrb[3].mxu0  ;;  %v637_v19 = vadd.f32 %v636_v17, %v325_v6  ;;  %v638_v21 = vpop.f32.mrb[3].mxu1  ;;  %v711_v22 = vmax.f32 %v520_v8, 0.0  ;;  %v713_v25 = vmax.f32 %v633_v11, 0.0 }
  0xf9   : > { %v526_v20 = vadd.f32 %v525_v18, %v325_v6  ;;  %v639_v24 = vadd.f32 %v638_v21, %v325_v6  ;;  %v712_v26 = vmax.f32 %v522_v12, 0.0  ;;  %v714_v29 = vmax.f32 %v635_v15, 0.0 }
  0xfa   : > { %v715_v23 = vmax.f32 %v524_v16, 0.0  ;;  %v717_v27 = vmax.f32 %v637_v19, 0.0 }
  0xfb   : > { %v716_v28 = vmax.f32 %v526_v20, 0.0  ;;  %v718_v31 = vmax.f32 %v639_v24, 0.0 }
  0xfc   : > { %v791_v30 = vpack.c.bf16 %v715_v23, %v711_v22  ;;  %v793_v33 = vpack.c.bf16 %v717_v27, %v713_v25  ;;  %v350_v25 = vpop.permute.xlu0 %349 }
  0xfd   : > { %v792_v34 = vpack.c.bf16 %v716_v28, %v712_v26  ;;  %v529_v35 = vpop.f32.mrb[4].mxu0  ;;  %v794_v36 = vpack.c.bf16 %v718_v31, %v714_v29  ;;  %v642_v38 = vpop.f32.mrb[4].mxu1 }
  0xfe   : > { %v530_v37 = vadd.f32 %v529_v35, %v330_v5  ;;  %v531_v39 = vpop.f32.mrb[5].mxu0  ;;  %v643_v40 = vadd.f32 %v642_v38, %v330_v5  ;;  %v644_v42 = vpop.f32.mrb[5].mxu1 }
  0xff   : > { %v532_v41 = vadd.f32 %v531_v39, %v330_v5  ;;  %v533_v43 = vpop.f32.mrb[6].mxu0  ;;  %967 = vmatprep.subr.bf16.mxu0 %v792_v34  ;;  %v645_v44 = vadd.f32 %v644_v42, %v330_v5  ;;  %v646_v46 = vpop.f32.mrb[6].mxu1  ;;  %1080 = vmatprep.subr.bf16.mxu1 %v794_v36 }
 0x100   : > { %v534_v45 = vadd.f32 %v533_v43, %v335_v32  ;;  %v535_v47 = vpop.f32.mrb[7].mxu0  ;;  %968 = vmatpush1.bf16.msra.mxu0 %v791_v30  ;;  %v647_v48 = vadd.f32 %v646_v46, %v335_v32  ;;  %v648_v50 = vpop.f32.mrb[7].mxu1  ;;  %1081 = vmatpush1.bf16.msra.mxu1 %v793_v33  ;;  %v719_v51 = vmax.f32 %v530_v37, 0.0  ;;  %v721_v54 = vmax.f32 %v643_v40, 0.0 }
 0x101   : > { %v536_v49 = vadd.f32 %v535_v47, %v335_v32  ;;  %v649_v53 = vadd.f32 %v648_v50, %v335_v32  ;;  %v720_v55 = vmax.f32 %v532_v41, 0.0  ;;  %v722_v59 = vmax.f32 %v645_v44, 0.0  ;;  %v355_v29 = vpop.permute.xlu1 %354 }
 0x102   : > { %v723_v52 = vmax.f32 %v534_v45, 0.0  ;;  %v725_v56 = vmax.f32 %v647_v48, 0.0 }
 0x103   : > { %v724_v57 = vmax.f32 %v536_v49, 0.0  ;;  %v726_v61 = vmax.f32 %v649_v53, 0.0 }
 0x104   : > { %v795_v60 = vpack.c.bf16 %v723_v52, %v719_v51  ;;  %v797_v63 = vpack.c.bf16 %v725_v56, %v721_v54 }
 0x105   : > { %v796_v0 = vpack.c.bf16 %v724_v57, %v720_v55  ;;  %v539_v1 = vpop.f32.mrb[8].mxu0  ;;  %v798_v3 = vpack.c.bf16 %v726_v61, %v722_v59  ;;  %v652_v5 = vpop.f32.mrb[8].mxu1 }
 0x106   : > { %v540_v4 = vadd.f32 %v539_v1, %v340_v58  ;;  %v541_v6 = vpop.f32.mrb[9].mxu0  ;;  %v653_v7 = vadd.f32 %v652_v5, %v340_v58  ;;  %v654_v9 = vpop.f32.mrb[9].mxu1 }
 0x107   : > { %v542_v8 = vadd.f32 %v541_v6, %v340_v58  ;;  %v543_v10 = vpop.f32.mrb[10].mxu0  ;;  %969 = vmatprep.subr.bf16.mxu0 %v796_v0  ;;  %v655_v11 = vadd.f32 %v654_v9, %v340_v58  ;;  %v656_v13 = vpop.f32.mrb[10].mxu1  ;;  %1082 = vmatprep.subr.bf16.mxu1 %v798_v3 }
 0x108   : > { %v544_v12 = vadd.f32 %v543_v10, %v345_v62  ;;  %v545_v14 = vpop.f32.mrb[11].mxu0  ;;  %970 = vmatpush1.bf16.msra.mxu0 %v795_v60  ;;  %v657_v15 = vadd.f32 %v656_v13, %v345_v62  ;;  %v658_v17 = vpop.f32.mrb[11].mxu1  ;;  %1083 = vmatpush1.bf16.msra.mxu1 %v797_v63  ;;  %v727_v18 = vmax.f32 %v540_v4, 0.0  ;;  %v729_v21 = vmax.f32 %v653_v7, 0.0 }
 0x109   : > { %v546_v16 = vadd.f32 %v545_v14, %v345_v62  ;;  %v659_v20 = vadd.f32 %v658_v17, %v345_v62  ;;  %v728_v22 = vmax.f32 %v542_v8, 0.0  ;;  %v730_v26 = vmax.f32 %v655_v11, 0.0  ;;  %v360_v55 = vpop.permute.xlu0 %359  ;;  %v365_v59 = vpop.permute.xlu1 %364 }
 0x10a   : > { %v731_v19 = vmax.f32 %v544_v12, 0.0  ;;  %v733_v23 = vmax.f32 %v657_v15, 0.0 }
 0x10b   : > { %v732_v24 = vmax.f32 %v546_v16, 0.0  ;;  %v734_v28 = vmax.f32 %v659_v20, 0.0 }
 0x10c   : > { %v799_v27 = vpack.c.bf16 %v731_v19, %v727_v18  ;;  %v801_v30 = vpack.c.bf16 %v733_v23, %v729_v21 }
 0x10d   : > { %v800_v31 = vpack.c.bf16 %v732_v24, %v728_v22  ;;  %v549_v32 = vpop.f32.mrb[12].mxu0  ;;  %v802_v33 = vpack.c.bf16 %v734_v28, %v730_v26  ;;  %v662_v35 = vpop.f32.mrb[12].mxu1 }
 0x10e   : > { %v550_v34 = vadd.f32 %v549_v32, %v350_v25  ;;  %v551_v36 = vpop.f32.mrb[13].mxu0  ;;  %v663_v37 = vadd.f32 %v662_v35, %v350_v25  ;;  %v664_v39 = vpop.f32.mrb[13].mxu1 }
 0x10f   : > { %v552_v38 = vadd.f32 %v551_v36, %v350_v25  ;;  %v553_v40 = vpop.f32.mrb[14].mxu0  ;;  %971 = vmatprep.subr.bf16.mxu0 %v800_v31  ;;  %v665_v41 = vadd.f32 %v664_v39, %v350_v25  ;;  %v666_v43 = vpop.f32.mrb[14].mxu1  ;;  %1084 = vmatprep.subr.bf16.mxu1 %v802_v33 }
 0x110   : > { %v554_v42 = vadd.f32 %v553_v40, %v355_v29  ;;  %v555_v44 = vpop.f32.mrb[15].mxu0  ;;  %972 = vmatpush1.bf16.msra.mxu0 %v799_v27  ;;  %v667_v45 = vadd.f32 %v666_v43, %v355_v29  ;;  %v668_v47 = vpop.f32.mrb[15].mxu1  ;;  %1085 = vmatpush1.bf16.msra.mxu1 %v801_v30  ;;  %v735_v48 = vmax.f32 %v550_v34, 0.0  ;;  %v737_v51 = vmax.f32 %v663_v37, 0.0 }
 0x111   : > { %v556_v46 = vadd.f32 %v555_v44, %v355_v29  ;;  %v669_v50 = vadd.f32 %v668_v47, %v355_v29  ;;  %v736_v52 = vmax.f32 %v552_v38, 0.0  ;;  %v738_v56 = vmax.f32 %v665_v41, 0.0  ;;  %v370_v22 = vpop.permute.xlu0 %369  ;;  %v375_v26 = vpop.permute.xlu1 %374 }
 0x112   : > { %v739_v49 = vmax.f32 %v554_v42, 0.0  ;;  %v741_v53 = vmax.f32 %v667_v45, 0.0 }
 0x113   : > { %v740_v54 = vmax.f32 %v556_v46, 0.0  ;;  %v742_v58 = vmax.f32 %v669_v50, 0.0 }
 0x114   : > { %v803_v57 = vpack.c.bf16 %v739_v49, %v735_v48  ;;  %v805_v60 = vpack.c.bf16 %v741_v53, %v737_v51 }
 0x115   : > { %v804_v61 = vpack.c.bf16 %v740_v54, %v736_v52  ;;  %v559_v62 = vpop.f32.mrb[16].mxu0  ;;  %v806_v63 = vpack.c.bf16 %v742_v58, %v738_v56  ;;  %v672_v1 = vpop.f32.mrb[16].mxu1 }
 0x116   : > { %v560_v0 = vadd.f32 %v559_v62, %v360_v55  ;;  %v561_v3 = vpop.f32.mrb[17].mxu0  ;;  %v673_v4 = vadd.f32 %v672_v1, %v360_v55  ;;  %v674_v6 = vpop.f32.mrb[17].mxu1 }
 0x117   : > { %v562_v5 = vadd.f32 %v561_v3, %v360_v55  ;;  %v563_v7 = vpop.f32.mrb[18].mxu0  ;;  %973 = vmatprep.subr.bf16.mxu0 %v804_v61  ;;  %v675_v8 = vadd.f32 %v674_v6, %v360_v55  ;;  %v676_v10 = vpop.f32.mrb[18].mxu1  ;;  %1086 = vmatprep.subr.bf16.mxu1 %v806_v63 }
 0x118   : > { %v564_v9 = vadd.f32 %v563_v7, %v365_v59  ;;  %v565_v11 = vpop.f32.mrb[19].mxu0  ;;  %974 = vmatpush1.bf16.msra.mxu0 %v803_v57  ;;  %v677_v12 = vadd.f32 %v676_v10, %v365_v59  ;;  %v678_v14 = vpop.f32.mrb[19].mxu1  ;;  %1087 = vmatpush1.bf16.msra.mxu1 %v805_v60  ;;  %v743_v15 = vmax.f32 %v560_v0, 0.0  ;;  %v745_v18 = vmax.f32 %v673_v4, 0.0 }
 0x119   : > { %v566_v13 = vadd.f32 %v565_v11, %v365_v59  ;;  %v679_v17 = vadd.f32 %v678_v14, %v365_v59  ;;  %v744_v19 = vmax.f32 %v562_v5, 0.0  ;;  %v746_v23 = vmax.f32 %v675_v8, 0.0  ;;  %v380_v52 = vpop.permute.xlu0 %379  ;;  %v385_v56 = vpop.permute.xlu1 %384 }
 0x11a   : > { %v747_v16 = vmax.f32 %v564_v9, 0.0  ;;  %v749_v20 = vmax.f32 %v677_v12, 0.0 }
 0x11b   : > { %v748_v21 = vmax.f32 %v566_v13, 0.0  ;;  %v750_v25 = vmax.f32 %v679_v17, 0.0 }
 0x11c   : > { %v807_v24 = vpack.c.bf16 %v747_v16, %v743_v15  ;;  %v809_v27 = vpack.c.bf16 %v749_v20, %v745_v18 }
 0x11d   : > { %v808_v28 = vpack.c.bf16 %v748_v21, %v744_v19  ;;  %v569_v29 = vpop.f32.mrb[20].mxu0  ;;  %v810_v30 = vpack.c.bf16 %v750_v25, %v746_v23  ;;  %v682_v32 = vpop.f32.mrb[20].mxu1 }
 0x11e   : > { %v570_v31 = vadd.f32 %v569_v29, %v370_v22  ;;  %v571_v33 = vpop.f32.mrb[21].mxu0  ;;  %v683_v34 = vadd.f32 %v682_v32, %v370_v22  ;;  %v684_v36 = vpop.f32.mrb[21].mxu1 }
 0x11f   : > { %v572_v35 = vadd.f32 %v571_v33, %v370_v22  ;;  %v573_v37 = vpop.f32.mrb[22].mxu0  ;;  %975 = vmatprep.subr.bf16.mxu0 %v808_v28  ;;  %v685_v38 = vadd.f32 %v684_v36, %v370_v22  ;;  %v686_v40 = vpop.f32.mrb[22].mxu1  ;;  %1088 = vmatprep.subr.bf16.mxu1 %v810_v30 }
 0x120   : > { %v574_v39 = vadd.f32 %v573_v37, %v375_v26  ;;  %v575_v41 = vpop.f32.mrb[23].mxu0  ;;  %976 = vmatpush1.bf16.msra.mxu0 %v807_v24  ;;  %v687_v42 = vadd.f32 %v686_v40, %v375_v26  ;;  %v688_v44 = vpop.f32.mrb[23].mxu1  ;;  %1089 = vmatpush1.bf16.msra.mxu1 %v809_v27  ;;  %v751_v45 = vmax.f32 %v570_v31, 0.0  ;;  %v753_v48 = vmax.f32 %v683_v34, 0.0 }
 0x121   : > { %v576_v43 = vadd.f32 %v575_v41, %v375_v26  ;;  %v689_v47 = vadd.f32 %v688_v44, %v375_v26  ;;  %v752_v49 = vmax.f32 %v572_v35, 0.0  ;;  %v754_v53 = vmax.f32 %v685_v38, 0.0  ;;  %v390_v19 = vpop.permute.xlu0 %389  ;;  %v395_v23 = vpop.permute.xlu1 %394 }
 0x122   : > { %v755_v46 = vmax.f32 %v574_v39, 0.0  ;;  %v757_v50 = vmax.f32 %v687_v42, 0.0 }
 0x123   : > { %v756_v51 = vmax.f32 %v576_v43, 0.0  ;;  %v758_v55 = vmax.f32 %v689_v47, 0.0 }
 0x124   : > { %v811_v54 = vpack.c.bf16 %v755_v46, %v751_v45  ;;  %v813_v57 = vpack.c.bf16 %v757_v50, %v753_v48 }
 0x125   : > { %v812_v58 = vpack.c.bf16 %v756_v51, %v752_v49  ;;  %v579_v59 = vpop.f32.mrb[24].mxu0  ;;  %v814_v60 = vpack.c.bf16 %v758_v55, %v754_v53  ;;  %v692_v62 = vpop.f32.mrb[24].mxu1  ;;  %v1757_v55 = vld [vmem:[%s2363_s3] sm:$0xff]  }
 0x126   : > { %v580_v61 = vadd.f32 %v579_v59, %v380_v52  ;;  %v581_v63 = vpop.f32.mrb[25].mxu0  ;;  %v693_v0 = vadd.f32 %v692_v62, %v380_v52  ;;  %v694_v3 = vpop.f32.mrb[25].mxu1  ;;  %v1761_v59 = vld [vmem:[%s2363_s3 + $0x20] sm:$0xff]   ;;  %v1764_v62 = vld [vmem:[%s2363_s3 + $0x38] sm:$0xff]  }
 0x127   : > { %v582_v1 = vadd.f32 %v581_v63, %v380_v52  ;;  %v583_v4 = vpop.f32.mrb[26].mxu0  ;;  %977 = vmatprep.subr.bf16.mxu0 %v812_v58  ;;  %v695_v5 = vadd.f32 %v694_v3, %v380_v52  ;;  %v696_v7 = vpop.f32.mrb[26].mxu1  ;;  %1090 = vmatprep.subr.bf16.mxu1 %v814_v60  ;;  %v1760_v58 = vld [vmem:[%s2363_s3 + $0x18] sm:$0xff]   ;;  %v1762_v60 = vld [vmem:[%s2363_s3 + $0x28] sm:$0xff]  }
 0x128   : > { %v584_v6 = vadd.f32 %v583_v4, %v385_v56  ;;  %v585_v8 = vpop.f32.mrb[27].mxu0  ;;  %978 = vmatpush1.bf16.msra.mxu0 %v811_v54  ;;  %v697_v9 = vadd.f32 %v696_v7, %v385_v56  ;;  %v698_v11 = vpop.f32.mrb[27].mxu1  ;;  %1091 = vmatpush1.bf16.msra.mxu1 %v813_v57  ;;  %v759_v12 = vmax.f32 %v580_v61, 0.0  ;;  %v761_v15 = vmax.f32 %v693_v0, 0.0  ;;  %v1759_v57 = vld [vmem:[%s2363_s3 + $0x10] sm:$0xff]  }
 0x129   : > { %v586_v10 = vadd.f32 %v585_v8, %v385_v56  ;;  %v699_v14 = vadd.f32 %v698_v11, %v385_v56  ;;  %v760_v16 = vmax.f32 %v582_v1, 0.0  ;;  %v762_v20 = vmax.f32 %v695_v5, 0.0  ;;  %v1758_v56 = vld [vmem:[%s2363_s3 + $0x8] sm:$0xff]   ;;  %v1763_v61 = vld [vmem:[%s2363_s3 + $0x30] sm:$0xff]   ;;  %v842_v63 = vpop.permute.xlu0 %841  ;;  %v847_v0 = vpop.permute.xlu1 %846 }
 0x12a   : > { %v763_v13 = vmax.f32 %v584_v6, 0.0  ;;  %v765_v17 = vmax.f32 %v697_v9, 0.0 }
 0x12b   : > { %v764_v18 = vmax.f32 %v586_v10, 0.0  ;;  %v766_v22 = vmax.f32 %v699_v14, 0.0 }
 0x12c   : > { %v815_v21 = vpack.c.bf16 %v763_v13, %v759_v12  ;;  %v817_v24 = vpack.c.bf16 %v765_v17, %v761_v15 }
 0x12d   : > { %v816_v25 = vpack.c.bf16 %v764_v18, %v760_v16  ;;  %v589_v26 = vpop.f32.mrb[28].mxu0  ;;  %v818_v27 = vpack.c.bf16 %v766_v22, %v762_v20  ;;  %v702_v29 = vpop.f32.mrb[28].mxu1 }
 0x12e   : > { %v590_v28 = vadd.f32 %v589_v26, %v390_v19  ;;  %v591_v30 = vpop.f32.mrb[29].mxu0  ;;  %v703_v31 = vadd.f32 %v702_v29, %v390_v19  ;;  %v704_v33 = vpop.f32.mrb[29].mxu1 }
 0x12f   : > { %v592_v32 = vadd.f32 %v591_v30, %v390_v19  ;;  %v593_v34 = vpop.f32.mrb[30].mxu0  ;;  %979 = vmatprep.subr.bf16.mxu0 %v816_v25  ;;  %v705_v35 = vadd.f32 %v704_v33, %v390_v19  ;;  %v706_v37 = vpop.f32.mrb[30].mxu1  ;;  %1092 = vmatprep.subr.bf16.mxu1 %v818_v27 }
 0x130   : > { %v594_v36 = vadd.f32 %v593_v34, %v395_v23  ;;  %v595_v38 = vpop.f32.mrb[31].mxu0  ;;  %980 = vmatpush1.bf16.msra.mxu0 %v815_v21  ;;  %v707_v39 = vadd.f32 %v706_v37, %v395_v23  ;;  %v708_v41 = vpop.f32.mrb[31].mxu1  ;;  %1093 = vmatpush1.bf16.msra.mxu1 %v817_v24  ;;  %v767_v42 = vmax.f32 %v590_v28, 0.0  ;;  %v769_v45 = vmax.f32 %v703_v31, 0.0 }
 0x131   : > { %v596_v40 = vadd.f32 %v595_v38, %v395_v23  ;;  %v709_v44 = vadd.f32 %v708_v41, %v395_v23  ;;  %v768_v46 = vmax.f32 %v592_v32, 0.0  ;;  %v770_v49 = vmax.f32 %v705_v35, 0.0  ;;  %v852_v1 = vpop.permute.xlu0 %851  ;;  %v2185_v3 = vpop.permute.xlu1 %856 }
 0x132   : > { %v771_v43 = vmax.f32 %v594_v36, 0.0  ;;  %v773_v47 = vmax.f32 %v707_v39, 0.0 }
 0x133   : > { %v772_v48 = vmax.f32 %v596_v40, 0.0  ;;  %v774_v51 = vmax.f32 %v709_v44, 0.0 }
 0x134   : > { %v819_v50 = vpack.c.bf16 %v771_v43, %v767_v42  ;;  %v821_v52 = vpack.c.bf16 %v773_v47, %v769_v45 }
 0x135   : > { %v820_v53 = vpack.c.bf16 %v772_v48, %v768_v46  ;;  %v822_v54 = vpack.c.bf16 %v774_v51, %v770_v49  ;;  %v1276_v4 = vpop.permute.xlu0 %1275  ;;  %v1281_v5 = vpop.permute.xlu1 %1280 }
 0x137   : > { %981 = vmatprep.subr.bf16.mxu0 %v820_v53  ;;  %1094 = vmatprep.subr.bf16.mxu1 %v822_v54 }
 0x138   : > { %982 = vmatpush1.bf16.msra.mxu0 %v819_v50  ;;  %1095 = vmatpush1.bf16.msra.mxu1 %v821_v52 }
 0x139   : > { %v2187_v6 = vpop.permute.xlu0 %861  ;;  %v2189_v7 = vpop.permute.xlu1 %1285 }
 0x13b   : > { %1000 = vmatmul.mubr.bf16.vlgmr.msra.gmra.mrb[32].mxu0 %v1757_v55  ;;  %1113 = vmatmul.mubr.bf16.vlgmr.msra.gmra.mrb[32].mxu1 %v1757_v55 }
 0x13c   : > { %1009 = vmatprep.mubr.bf16.mxu0 %v1845_v2  ;;  %1122 = vmatprep.mubr.bf16.mxu1 %v1845_v2 }
 0x13d   : > { %v2191_v8 = vpop.permute.xlu0 %866 }
 0x141   : > { %v2195_v9 = vpop.permute.xlu0 %871 }
 0x143   : > { %1010 = vmatmul.mubr.bf16.gmra.mrb[36].mxu0 %v1758_v56  ;;  %1123 = vmatmul.mubr.bf16.gmra.mrb[36].mxu1 %v1758_v56 }
 0x144   : > { %1019 = vmatprep.mubr.bf16.mxu0 %v1845_v2  ;;  %1132 = vmatprep.mubr.bf16.mxu1 %v1845_v2 }
 0x145   : > { %v2199_v11 = vpop.permute.xlu0 %876 }
 0x149   : > { %v2203_v13 = vpop.permute.xlu0 %881 }
 0x14b   : > { %1020 = vmatmul.mubr.bf16.gmra.mrb[40].mxu0 %v1759_v57  ;;  %1133 = vmatmul.mubr.bf16.gmra.mrb[40].mxu1 %v1759_v57 }
 0x14c   : > { %1029 = vmatprep.mubr.bf16.mxu0 %v1845_v2  ;;  %1142 = vmatprep.mubr.bf16.mxu1 %v1845_v2 }
 0x14d   : > { %v2207_v38 = vpop.permute.xlu0 %886 }
 0x153   : > { %1030 = vmatmul.mubr.bf16.gmra.mrb[44].mxu0 %v1760_v58  ;;  %1143 = vmatmul.mubr.bf16.gmra.mrb[44].mxu1 %v1760_v58 }
 0x154   : > { %1039 = vmatprep.mubr.bf16.mxu0 %v1845_v2  ;;  %1152 = vmatprep.mubr.bf16.mxu1 %v1845_v2 }
 0x15b   : > { %1040 = vmatmul.mubr.bf16.gmra.mrb[48].mxu0 %v1761_v59  ;;  %1153 = vmatmul.mubr.bf16.gmra.mrb[48].mxu1 %v1761_v59 }
 0x15c   : > { %1049 = vmatprep.mubr.bf16.mxu0 %v1845_v2  ;;  %1162 = vmatprep.mubr.bf16.mxu1 %v1845_v2 }
 0x163   : > { %1050 = vmatmul.mubr.bf16.gmra.mrb[52].mxu0 %v1762_v60  ;;  %1163 = vmatmul.mubr.bf16.gmra.mrb[52].mxu1 %v1762_v60 }
 0x164   : > { %1059 = vmatprep.mubr.bf16.mxu0 %v1845_v2  ;;  %1172 = vmatprep.mubr.bf16.mxu1 %v1845_v2 }
 0x16b   : > { %1060 = vmatmul.mubr.bf16.gmra.mrb[56].mxu0 %v1763_v61  ;;  %1173 = vmatmul.mubr.bf16.gmra.mrb[56].mxu1 %v1763_v61 }
 0x16c   : > { %1069 = vmatprep.mubr.bf16.mxu0 %v1845_v2  ;;  %1182 = vmatprep.mubr.bf16.mxu1 %v1845_v2  ;;  %v2193_v2 = vpop.permute.xlu1 %1290 }
 0x170   : > { %v2197_v10 = vpop.permute.xlu1 %1295 }
 0x173   : > { %1070 = vmatmul.mubr.bf16.gmra.mrb[60].mxu0 %v1764_v62  ;;  %1183 = vmatmul.mubr.bf16.gmra.mrb[60].mxu1 %v1764_v62 }
 0x174   : > { %v2201_v12 = vpop.permute.xlu1 %1300 }
 0x178   : > { %v2205_v14 = vpop.permute.xlu1 %1305 }
 0x17c   : > { %v2209_v42 = vpop.permute.xlu1 %1310 }
 0x20e   : > { %v1001_v15 = vpop.f32.mrb[32].mxu0  ;;  %v1114_v17 = vpop.f32.mrb[32].mxu1 }
 0x20f   : > { %v1002_v16 = vadd.f32 %v1001_v15, %v842_v63  ;;  %v1003_v18 = vpop.f32.mrb[33].mxu0  ;;  %v1115_v19 = vadd.f32 %v1114_v17, %v842_v63  ;;  %v1116_v21 = vpop.f32.mrb[33].mxu1 }
 0x210   : > { %v1004_v20 = vadd.f32 %v1003_v18, %v842_v63  ;;  %v1005_v22 = vpop.f32.mrb[34].mxu0  ;;  %v1117_v24 = vadd.f32 %v1116_v21, %v842_v63  ;;  %v1118_v26 = vpop.f32.mrb[34].mxu1 }
 0x211   : > { %v1193_v23 = vmax.f32 %v1002_v16, 0.0  ;;  %v1006_v25 = vadd.f32 %v1005_v22, %v847_v0  ;;  %v1007_v27 = vpop.f32.mrb[35].mxu0  ;;  %v1195_v28 = vmax.f32 %v1115_v19, 0.0  ;;  %v1119_v30 = vadd.f32 %v1118_v26, %v847_v0  ;;  %v1120_v32 = vpop.f32.mrb[35].mxu1 }
 0x212   : > { %v1194_v29 = vmax.f32 %v1004_v20, 0.0  ;;  %v1008_v31 = vadd.f32 %v1007_v27, %v847_v0  ;;  %v1196_v33 = vmax.f32 %v1117_v24, 0.0  ;;  %v1121_v35 = vadd.f32 %v1120_v32, %v847_v0  ;;  %v2218_v26 = vpop.permute.xlu0 %891 }
 0x213   : > { %v1197_v34 = vmax.f32 %v1006_v25, 0.0  ;;  %v1199_v36 = vmax.f32 %v1119_v30, 0.0  ;;  %v1353_v39 = vmul.f32 %v1276_v4, %v1193_v23  ;;  %v1355_v43 = vmul.f32 %v1276_v4, %v1195_v28 }
 0x214   : > { %v1198_v37 = vmax.f32 %v1008_v31, 0.0  ;;  %v1200_v41 = vmax.f32 %v1121_v35, 0.0  ;;  %v1354_v44 = vmul.f32 %v1276_v4, %v1194_v29  ;;  %v1356_v48 = vmul.f32 %v1276_v4, %v1196_v33  ;;  %v2222_v31 = vpop.permute.xlu1 %1315 }
 0x215   : > { %v1357_v40 = vmul.f32 %v1281_v5, %v1197_v34  ;;  %v1359_v45 = vmul.f32 %v1281_v5, %v1199_v36 }
 0x216   : > { %v1358_v46 = vmul.f32 %v1281_v5, %v1198_v37  ;;  %v1011_v47 = vpop.f32.mrb[36].mxu0  ;;  %v1360_v50 = vmul.f32 %v1281_v5, %v1200_v41  ;;  %v1124_v52 = vpop.f32.mrb[36].mxu1 }
 0x217   : > { %v1417_v49 = vadd.f32 %v1357_v40, %v1353_v39  ;;  %v1012_v51 = vadd.f32 %v1011_v47, %v852_v1  ;;  %v1013_v53 = vpop.f32.mrb[37].mxu0  ;;  %v1459_v54 = vadd.f32 %v1359_v45, %v1355_v43  ;;  %v1125_v56 = vadd.f32 %v1124_v52, %v852_v1  ;;  %v1126_v58 = vpop.f32.mrb[37].mxu1 }
 0x218   : > { %v1438_v55 = vadd.f32 %v1358_v46, %v1354_v44  ;;  %v1014_v57 = vadd.f32 %v1013_v53, %v852_v1  ;;  %v1015_v59 = vpop.f32.mrb[38].mxu0  ;;  %v1480_v60 = vadd.f32 %v1360_v50, %v1356_v48  ;;  %v1127_v62 = vadd.f32 %v1126_v58, %v852_v1  ;;  %v1128_v0 = vpop.f32.mrb[38].mxu1 }
 0x219   : > { %v1201_v61 = vmax.f32 %v1012_v51, 0.0  ;;  %v1016_v63 = vadd.f32 %v1015_v59, %v2185_v3  ;;  %v1017_v15 = vpop.f32.mrb[39].mxu0  ;;  %v1203_v16 = vmax.f32 %v1125_v56, 0.0  ;;  %v1129_v5 = vadd.f32 %v1128_v0, %v2185_v3  ;;  %v1130_v18 = vpop.f32.mrb[39].mxu1 }
 0x21a   : > { %v1202_v4 = vmax.f32 %v1014_v57, 0.0  ;;  %v1018_v17 = vadd.f32 %v1017_v15, %v2185_v3  ;;  %v1204_v20 = vmax.f32 %v1127_v62, 0.0  ;;  %v1131_v22 = vadd.f32 %v1130_v18, %v2185_v3 }
 0x21b   : > { %v1361_v19 = vmul.f32 %v2189_v7, %v1201_v61  ;;  %v1205_v21 = vmax.f32 %v1016_v63, 0.0  ;;  %v1363_v23 = vmul.f32 %v2189_v7, %v1203_v16  ;;  %v1207_v24 = vmax.f32 %v1129_v5, 0.0  ;;  %v2238_v16 = vpop.permute.xlu0 %896 }
 0x21c   : > { %v1362_v1 = vmul.f32 %v2189_v7, %v1202_v4  ;;  %v1206_v25 = vmax.f32 %v1018_v17, 0.0  ;;  %v1364_v28 = vmul.f32 %v2189_v7, %v1204_v20  ;;  %v1208_v30 = vmax.f32 %v1131_v22, 0.0 }
 0x21d   : > { %v1418_v27 = vadd.f32 %v1417_v49, %v1361_v19  ;;  %v1365_v29 = vmul.f32 %v2193_v2, %v1205_v21  ;;  %v1460_v32 = vadd.f32 %v1459_v54, %v1363_v23  ;;  %v1367_v3 = vmul.f32 %v2193_v2, %v1207_v24  ;;  %v2242_v19 = vpop.permute.xlu1 %1320 }
 0x21e   : > { %v1439_v33 = vadd.f32 %v1438_v55, %v1362_v1  ;;  %v1366_v34 = vmul.f32 %v2193_v2, %v1206_v25  ;;  %v1021_v35 = vpop.f32.mrb[40].mxu0  ;;  %v1481_v36 = vadd.f32 %v1480_v60, %v1364_v28  ;;  %v1368_v39 = vmul.f32 %v2193_v2, %v1208_v30  ;;  %v1134_v41 = vpop.f32.mrb[40].mxu1 }
 0x21f   : > { %v1419_v37 = vadd.f32 %v1418_v27, %v1365_v29  ;;  %v1022_v40 = vadd.f32 %v1021_v35, %v2187_v6  ;;  %v1023_v7 = vpop.f32.mrb[41].mxu0  ;;  %v1461_v43 = vadd.f32 %v1460_v32, %v1367_v3  ;;  %v1135_v45 = vadd.f32 %v1134_v41, %v2187_v6  ;;  %v1136_v47 = vpop.f32.mrb[41].mxu1 }
 0x220   : > { %v1440_v44 = vadd.f32 %v1439_v33, %v1366_v34  ;;  %v1024_v46 = vadd.f32 %v1023_v7, %v2187_v6  ;;  %v1025_v48 = vpop.f32.mrb[42].mxu0  ;;  %v1482_v49 = vadd.f32 %v1481_v36, %v1368_v39  ;;  %v1137_v51 = vadd.f32 %v1136_v47, %v2187_v6  ;;  %v1138_v53 = vpop.f32.mrb[42].mxu1 }
 0x221   : > { %v1209_v50 = vmax.f32 %v1022_v40, 0.0  ;;  %v1026_v52 = vadd.f32 %v1025_v48, %v2191_v8  ;;  %v1027_v2 = vpop.f32.mrb[43].mxu0  ;;  %v1211_v54 = vmax.f32 %v1135_v45, 0.0  ;;  %v1139_v56 = vadd.f32 %v1138_v53, %v2191_v8  ;;  %v1140_v58 = vpop.f32.mrb[43].mxu1 }
 0x222   : > { %v1210_v55 = vmax.f32 %v1024_v46, 0.0  ;;  %v1028_v57 = vadd.f32 %v1027_v2, %v2191_v8  ;;  %v1212_v60 = vmax.f32 %v1137_v51, 0.0  ;;  %v1141_v62 = vadd.f32 %v1140_v58, %v2191_v8  ;;  %v2258_v53 = vpop.permute.xlu0 %901 }
 0x223   : > { %v1369_v59 = vmul.f32 %v2197_v10, %v1209_v50  ;;  %v1213_v61 = vmax.f32 %v1026_v52, 0.0  ;;  %v1371_v63 = vmul.f32 %v2197_v10, %v1211_v54  ;;  %v1215_v0 = vmax.f32 %v1139_v56, 0.0 }
 0x224   : > { %v1370_v6 = vmul.f32 %v2197_v10, %v1210_v55  ;;  %v1214_v15 = vmax.f32 %v1028_v57, 0.0  ;;  %v1372_v5 = vmul.f32 %v2197_v10, %v1212_v60  ;;  %v1216_v18 = vmax.f32 %v1141_v62, 0.0  ;;  %v2262_v57 = vpop.permute.xlu1 %1325 }
 0x225   : > { %v1420_v4 = vadd.f32 %v1419_v37, %v1369_v59  ;;  %v1373_v17 = vmul.f32 %v2201_v12, %v1213_v61  ;;  %v1462_v20 = vadd.f32 %v1461_v43, %v1371_v63  ;;  %v1375_v8 = vmul.f32 %v2201_v12, %v1215_v0 }
 0x226   : > { %v1441_v21 = vadd.f32 %v1440_v44, %v1370_v6  ;;  %v1374_v22 = vmul.f32 %v2201_v12, %v1214_v15  ;;  %v1031_v23 = vpop.f32.mrb[44].mxu0  ;;  %v1483_v1 = vadd.f32 %v1482_v49, %v1372_v5  ;;  %v1376_v25 = vmul.f32 %v2201_v12, %v1216_v18  ;;  %v1144_v28 = vpop.f32.mrb[44].mxu1 }
 0x227   : > { %v1421_v24 = vadd.f32 %v1420_v4, %v1373_v17  ;;  %v1032_v27 = vadd.f32 %v1031_v23, %v2195_v9  ;;  %v1033_v10 = vpop.f32.mrb[45].mxu0  ;;  %v1463_v29 = vadd.f32 %v1462_v20, %v1375_v8  ;;  %v1145_v32 = vadd.f32 %v1144_v28, %v2195_v9  ;;  %v1146_v3 = vpop.f32.mrb[45].mxu1 }
 0x228   : > { %v1442_v30 = vadd.f32 %v1441_v21, %v1374_v22  ;;  %v1034_v33 = vadd.f32 %v1033_v10, %v2195_v9  ;;  %v1035_v34 = vpop.f32.mrb[46].mxu0  ;;  %v1484_v35 = vadd.f32 %v1483_v1, %v1376_v25  ;;  %v1147_v37 = vadd.f32 %v1146_v3, %v2195_v9  ;;  %v1148_v40 = vpop.f32.mrb[46].mxu1 }
 0x229   : > { %v1217_v36 = vmax.f32 %v1032_v27, 0.0  ;;  %v1036_v39 = vadd.f32 %v1035_v34, %v2199_v11  ;;  %v1037_v12 = vpop.f32.mrb[47].mxu0  ;;  %v1219_v41 = vmax.f32 %v1145_v32, 0.0  ;;  %v1149_v43 = vadd.f32 %v1148_v40, %v2199_v11  ;;  %v1150_v45 = vpop.f32.mrb[47].mxu1 }
 0x22a   : > { %v1218_v7 = vmax.f32 %v1034_v33, 0.0  ;;  %v1038_v44 = vadd.f32 %v1037_v12, %v2199_v11  ;;  %v1220_v47 = vmax.f32 %v1147_v37, 0.0  ;;  %v1151_v49 = vadd.f32 %v1150_v45, %v2199_v11  ;;  %v2278_v37 = vpop.permute.xlu0 %906 }
 0x22b   : > { %v1377_v46 = vmul.f32 %v2205_v14, %v1217_v36  ;;  %v1221_v48 = vmax.f32 %v1036_v39, 0.0  ;;  %v1379_v50 = vmul.f32 %v2205_v14, %v1219_v41  ;;  %v1223_v51 = vmax.f32 %v1149_v43, 0.0 }
 0x22c   : > { %v1378_v9 = vmul.f32 %v2205_v14, %v1218_v7  ;;  %v1222_v52 = vmax.f32 %v1038_v44, 0.0  ;;  %v1380_v54 = vmul.f32 %v2205_v14, %v1220_v47  ;;  %v1224_v56 = vmax.f32 %v1151_v49, 0.0  ;;  %v1331_v7 = vpop.permute.xlu1 %1330 }
 0x22d   : > { %v1422_v2 = vadd.f32 %v1421_v24, %v1377_v46  ;;  %v1381_v55 = vmul.f32 %v2209_v42, %v1221_v48  ;;  %v1464_v58 = vadd.f32 %v1463_v29, %v1379_v50  ;;  %v1383_v11 = vmul.f32 %v2209_v42, %v1223_v51 }
 0x22e   : > { %v1443_v59 = vadd.f32 %v1442_v30, %v1378_v9  ;;  %v1382_v60 = vmul.f32 %v2209_v42, %v1222_v52  ;;  %v1041_v61 = vpop.f32.mrb[48].mxu0  ;;  %v1485_v62 = vadd.f32 %v1484_v35, %v1380_v54  ;;  %v1384_v6 = vmul.f32 %v2209_v42, %v1224_v56  ;;  %v1154_v15 = vpop.f32.mrb[48].mxu1 }
 0x22f   : > { %v1423_v63 = vadd.f32 %v1422_v2, %v1381_v55  ;;  %v1042_v0 = vadd.f32 %v1041_v61, %v2203_v13  ;;  %v1043_v14 = vpop.f32.mrb[49].mxu0  ;;  %v1465_v4 = vadd.f32 %v1464_v58, %v1383_v11  ;;  %v1155_v17 = vadd.f32 %v1154_v15, %v2203_v13  ;;  %v1156_v20 = vpop.f32.mrb[49].mxu1 }
 0x230   : > { %v1444_v5 = vadd.f32 %v1443_v59, %v1382_v60  ;;  %v1044_v18 = vadd.f32 %v1043_v14, %v2203_v13  ;;  %v1045_v21 = vpop.f32.mrb[50].mxu0  ;;  %v1486_v8 = vadd.f32 %v1485_v62, %v1384_v6  ;;  %v1157_v23 = vadd.f32 %v1156_v20, %v2203_v13  ;;  %v1158_v24 = vpop.f32.mrb[50].mxu1 }
 0x231   : > { %v1225_v22 = vmax.f32 %v1042_v0, 0.0  ;;  %v1046_v1 = vadd.f32 %v1045_v21, %v2207_v38  ;;  %v1047_v42 = vpop.f32.mrb[51].mxu0  ;;  %v1227_v25 = vmax.f32 %v1155_v17, 0.0  ;;  %v1159_v28 = vadd.f32 %v1158_v24, %v2207_v38  ;;  %v1160_v29 = vpop.f32.mrb[51].mxu1 }
 0x232   : > { %v1226_v27 = vmax.f32 %v1044_v18, 0.0  ;;  %v1048_v10 = vadd.f32 %v1047_v42, %v2207_v38  ;;  %v1228_v32 = vmax.f32 %v1157_v23, 0.0  ;;  %v1161_v3 = vadd.f32 %v1160_v29, %v2207_v38  ;;  %v1336_v42 = vpop.permute.xlu1 %1335 }
 0x233   : > { %v1385_v30 = vmul.f32 %v2222_v31, %v1225_v22  ;;  %v1229_v33 = vmax.f32 %v1046_v1, 0.0  ;;  %v1387_v34 = vmul.f32 %v2222_v31, %v1227_v25  ;;  %v1231_v35 = vmax.f32 %v1159_v28, 0.0 }
 0x234   : > { %v1386_v13 = vmul.f32 %v2222_v31, %v1226_v27  ;;  %v1230_v36 = vmax.f32 %v1048_v10, 0.0  ;;  %v1388_v40 = vmul.f32 %v2222_v31, %v1228_v32  ;;  %v1232_v41 = vmax.f32 %v1161_v3, 0.0 }
 0x235   : > { %v1424_v39 = vadd.f32 %v1423_v63, %v1385_v30  ;;  %v1389_v12 = vmul.f32 %v2242_v19, %v1229_v33  ;;  %v1466_v43 = vadd.f32 %v1465_v4, %v1387_v34  ;;  %v1391_v45 = vmul.f32 %v2242_v19, %v1231_v35 }
 0x236   : > { %v1445_v44 = vadd.f32 %v1444_v5, %v1386_v13  ;;  %v1390_v38 = vmul.f32 %v2242_v19, %v1230_v36  ;;  %v1051_v46 = vpop.f32.mrb[52].mxu0  ;;  %v1487_v47 = vadd.f32 %v1486_v8, %v1388_v40  ;;  %v1392_v49 = vmul.f32 %v2242_v19, %v1232_v41  ;;  %v1164_v9 = vpop.f32.mrb[52].mxu1 }
 0x237   : > { %v1425_v48 = vadd.f32 %v1424_v39, %v1389_v12  ;;  %v1052_v50 = vadd.f32 %v1051_v46, %v2218_v26  ;;  %v1053_v51 = vpop.f32.mrb[53].mxu0  ;;  %v1467_v31 = vadd.f32 %v1466_v43, %v1391_v45  ;;  %v1165_v2 = vadd.f32 %v1164_v9, %v2218_v26  ;;  %v1166_v55 = vpop.f32.mrb[53].mxu1 }
 0x238   : > { %v1446_v52 = vadd.f32 %v1445_v44, %v1390_v38  ;;  %v1054_v54 = vadd.f32 %v1053_v51, %v2218_v26  ;;  %v1055_v56 = vpop.f32.mrb[54].mxu0  ;;  %v1488_v58 = vadd.f32 %v1487_v47, %v1392_v49  ;;  %v1167_v11 = vadd.f32 %v1166_v55, %v2218_v26  ;;  %v1168_v61 = vpop.f32.mrb[54].mxu1 }
 0x239   : > { %v1233_v59 = vmax.f32 %v1052_v50, 0.0  ;;  %v1056_v60 = vadd.f32 %v1055_v56, %v2238_v16  ;;  %v1057_v19 = vpop.f32.mrb[55].mxu0  ;;  %v1235_v62 = vmax.f32 %v1165_v2, 0.0  ;;  %v1169_v6 = vadd.f32 %v1168_v61, %v2238_v16  ;;  %v1170_v15 = vpop.f32.mrb[55].mxu1 }
 0x23a   : > { %v1234_v63 = vmax.f32 %v1054_v54, 0.0  ;;  %v1058_v0 = vadd.f32 %v1057_v19, %v2238_v16  ;;  %v1236_v4 = vmax.f32 %v1167_v11, 0.0  ;;  %v1171_v17 = vadd.f32 %v1170_v15, %v2238_v16  ;;  %v2296_v8 = vpop.permute.xlu0 %911  ;;  %v1341_v2 = vpop.permute.xlu1 %1340 }
 0x23b   : > { %v1393_v14 = vmul.f32 %v2262_v57, %v1233_v59  ;;  %v1237_v5 = vmax.f32 %v1056_v60, 0.0  ;;  %v1395_v18 = vmul.f32 %v2262_v57, %v1235_v62  ;;  %v1239_v20 = vmax.f32 %v1169_v6, 0.0 }
 0x23c   : > { %v1394_v26 = vmul.f32 %v2262_v57, %v1234_v63  ;;  %v1238_v21 = vmax.f32 %v1058_v0, 0.0  ;;  %v1396_v23 = vmul.f32 %v2262_v57, %v1236_v4  ;;  %v1240_v24 = vmax.f32 %v1171_v17, 0.0 }
 0x23d   : > { %v1426_v22 = vadd.f32 %v1425_v48, %v1393_v14  ;;  %v1397_v1 = vmul.f32 %v1331_v7, %v1237_v5  ;;  %v1468_v25 = vadd.f32 %v1467_v31, %v1395_v18  ;;  %v1399_v28 = vmul.f32 %v1331_v7, %v1239_v20 }
 0x23e   : > { %v1447_v27 = vadd.f32 %v1446_v52, %v1394_v26  ;;  %v1398_v10 = vmul.f32 %v1331_v7, %v1238_v21  ;;  %v1061_v29 = vpop.f32.mrb[56].mxu0  ;;  %v1489_v16 = vadd.f32 %v1488_v58, %v1396_v23  ;;  %v1400_v32 = vmul.f32 %v1331_v7, %v1240_v24  ;;  %v1174_v3 = vpop.f32.mrb[56].mxu1 }
 0x23f   : > { %v1427_v30 = vadd.f32 %v1426_v22, %v1397_v1  ;;  %v1062_v33 = vadd.f32 %v1061_v29, %v2258_v53  ;;  %v1063_v34 = vpop.f32.mrb[57].mxu0  ;;  %v1469_v13 = vadd.f32 %v1468_v25, %v1399_v28  ;;  %v1175_v36 = vadd.f32 %v1174_v3, %v2258_v53  ;;  %v1176_v39 = vpop.f32.mrb[57].mxu1 }
 0x240   : > { %v1448_v35 = vadd.f32 %v1447_v27, %v1398_v10  ;;  %v1064_v57 = vadd.f32 %v1063_v34, %v2258_v53  ;;  %v1065_v40 = vpop.f32.mrb[58].mxu0  ;;  %v1490_v12 = vadd.f32 %v1489_v16, %v1400_v32  ;;  %v1177_v43 = vadd.f32 %v1176_v39, %v2258_v53  ;;  %v1178_v45 = vpop.f32.mrb[58].mxu1 }
 0x241   : > { %v1241_v41 = vmax.f32 %v1062_v33, 0.0  ;;  %v1066_v44 = vadd.f32 %v1065_v40, %v2278_v37  ;;  %v1067_v7 = vpop.f32.mrb[59].mxu0  ;;  %v1243_v38 = vmax.f32 %v1175_v36, 0.0  ;;  %v1179_v47 = vadd.f32 %v1178_v45, %v2278_v37  ;;  %v1180_v49 = vpop.f32.mrb[59].mxu1 }
 0x242   : > { %v1242_v46 = vmax.f32 %v1064_v57, 0.0  ;;  %v1068_v48 = vadd.f32 %v1067_v7, %v2278_v37  ;;  %v1244_v9 = vmax.f32 %v1177_v43, 0.0  ;;  %v1181_v31 = vadd.f32 %v1180_v49, %v2278_v37  ;;  %v917_v52 = vpop.permute.xlu0 %916 }
 0x243   : > { %v1401_v50 = vmul.f32 %v1336_v42, %v1241_v41  ;;  %v1245_v51 = vmax.f32 %v1066_v44, 0.0  ;;  %v1403_v54 = vmul.f32 %v1336_v42, %v1243_v38  ;;  %v1247_v55 = vmax.f32 %v1179_v47, 0.0 }
 0x244   : > { %v1402_v53 = vmul.f32 %v1336_v42, %v1242_v46  ;;  %v1246_v56 = vmax.f32 %v1068_v48, 0.0  ;;  %v1404_v59 = vmul.f32 %v1336_v42, %v1244_v9  ;;  %v1248_v60 = vmax.f32 %v1181_v31, 0.0 }
 0x245   : > { %v1428_v58 = vadd.f32 %v1427_v30, %v1401_v50  ;;  %v1405_v11 = vmul.f32 %v1341_v2, %v1245_v51  ;;  %v1470_v61 = vadd.f32 %v1469_v13, %v1403_v54  ;;  %v1407_v62 = vmul.f32 %v1341_v2, %v1247_v55 }
 0x246   : > { %v1449_v19 = vadd.f32 %v1448_v35, %v1402_v53  ;;  %v1406_v63 = vmul.f32 %v1341_v2, %v1246_v56  ;;  %v1071_v6 = vpop.f32.mrb[60].mxu0  ;;  %v1491_v0 = vadd.f32 %v1490_v12, %v1404_v59  ;;  %v1408_v14 = vmul.f32 %v1341_v2, %v1248_v60  ;;  %v1184_v4 = vpop.f32.mrb[60].mxu1 }
 0x247   : > { %v1429_v15 = vadd.f32 %v1428_v58, %v1405_v11  ;;  %v1072_v37 = vadd.f32 %v1071_v6, %v2296_v8  ;;  %v1073_v5 = vpop.f32.mrb[61].mxu0  ;;  %v1471_v17 = vadd.f32 %v1470_v61, %v1407_v62  ;;  %v1185_v26 = vadd.f32 %v1184_v4, %v2296_v8  ;;  %v1186_v21 = vpop.f32.mrb[61].mxu1 }
 0x248   : > { %v1450_v18 = vadd.f32 %v1449_v19, %v1406_v63  ;;  %v1074_v20 = vadd.f32 %v1073_v5, %v2296_v8  ;;  %v1075_v22 = vpop.f32.mrb[62].mxu0  ;;  %v1492_v23 = vadd.f32 %v1491_v0, %v1408_v14  ;;  %v1187_v24 = vadd.f32 %v1186_v21, %v2296_v8  ;;  %v1188_v25 = vpop.f32.mrb[62].mxu1 }
 0x249   : > { %v1249_v1 = vmax.f32 %v1072_v37, 0.0  ;;  %v1076_v42 = vadd.f32 %v1075_v22, %v917_v52  ;;  %v1077_v27 = vpop.f32.mrb[63].mxu0  ;;  %v1346_v28 = vpop.permute.xlu0 %1345  ;;  %v1251_v10 = vmax.f32 %v1185_v26, 0.0  ;;  %v1189_v16 = vadd.f32 %v1188_v25, %v917_v52 }
 0x24a   : > { %v1250_v29 = vmax.f32 %v1074_v20, 0.0  ;;  %v1078_v30 = vadd.f32 %v1077_v27, %v917_v52  ;;  %v1190_v32 = vpop.f32.mrb[63].mxu1  ;;  %v1252_v3 = vmax.f32 %v1187_v24, 0.0  ;;  %v1351_v35 = vpop.permute.xlu1 %1350  ;;  %v1507_v46 = vlaneseq }
 0x24b   : > { %v1409_v33 = vmul.f32 %v1346_v28, %v1249_v1  ;;  %v1253_v34 = vmax.f32 %v1076_v42, 0.0  ;;  %v1191_v13 = vadd.f32 %v1190_v32, %v917_v52  ;;  %v1411_v36 = vmul.f32 %v1346_v28, %v1251_v10 }
 0x24c   : > { %v1410_v57 = vmul.f32 %v1346_v28, %v1250_v29  ;;  %v1255_v39 = vmax.f32 %v1189_v16, 0.0  ;;  %v1254_v40 = vmax.f32 %v1078_v30, 0.0  ;;  %v1412_v8 = vmul.f32 %v1346_v28, %v1252_v3 }
 0x24d   : > { %v1430_v12 = vadd.f32 %v1429_v15, %v1409_v33  ;;  %v1413_v41 = vmul.f32 %v1351_v35, %v1253_v34  ;;  %v1256_v43 = vmax.f32 %v1191_v13, 0.0  ;;  %v1472_v44 = vadd.f32 %v1471_v17, %v1411_v36  ;;  %v1505_v6 = vpop.permute.xlu0 %1504 }
 0x24e   : > { %v1451_v45 = vadd.f32 %v1450_v18, %v1410_v57  ;;  %v1415_v7 = vmul.f32 %v1351_v35, %v1255_v39  ;;  %v1414_v38 = vmul.f32 %v1351_v35, %v1254_v40  ;;  %v1493_v47 = vadd.f32 %v1492_v23, %v1412_v8 }
 0x24f   : > { %v1431_v48 = vadd.f32 %v1430_v12, %v1413_v41  ;;  %v1416_v49 = vmul.f32 %v1351_v35, %v1256_v43  ;;  %v1508_v54 = vshrl.u32 %v1507_v46, 7  ;;  %v1846_v35 = vmov 1966171168  }
 0x250   : > { %v1473_v50 = vadd.f32 %v1472_v44, %v1415_v7  ;;  %v1452_v9 = vadd.f32 %v1451_v45, %v1414_v38  ;;  %v1546_v36 = vunpack.c.l.s4 %v1846_v35  ;;  %vm1570_vm2 = vcmp.lt.s32.totalorder %v1507_v46, 512 }
 0x251   : > { %v1432_v51 = vrot.slane %v1431_v48, 4  ;;  %v1494_v31 = vadd.f32 %v1493_v47, %v1416_v49  ;;  %v1509_v19 = vsub.s32 0, %v1508_v54 }
 0x252   : > { %v1474_v52 = vrot.slane %v1473_v50, 4  ;;  %v1453_v2 = vrot.slane %v1452_v9, 4  ;;  %v1547_v57 = vunpack.c.0.s8 %v1546_v36 }
 0x253   : > { %v1433_v53 = vadd.f32 %v1432_v51, %v1431_v48  ;;  %v1495_v55 = vrot.slane %v1494_v31, 4  ;;  %v1510_v17 = vrot.slane %v1505_v6, %v1509_v19 }
 0x254   : > { %v1475_v56 = vadd.f32 %v1474_v52, %v1473_v50  ;;  %v1454_v58 = vadd.f32 %v1453_v2, %v1452_v9  ;;  %v1550_v12 = vsub.s32 %v1547_v57, %v1508_v54 }
 0x255   : > { %v1434_v59 = vrot.slane %v1433_v53, 2  ;;  %v1496_v11 = vadd.f32 %v1495_v55, %v1494_v31 }
 0x256   : > { %v1476_v60 = vrot.slane %v1475_v56, 2  ;;  %v1455_v61 = vrot.slane %v1454_v58, 2 }
 0x257   : > { %v1435_v62 = vadd.f32 %v1434_v59, %v1433_v53  ;;  %v1497_v63 = vrot.slane %v1496_v11, 2 }
 0x258   : > { %v1477_v0 = vadd.f32 %v1476_v60, %v1475_v56  ;;  %v1456_v15 = vadd.f32 %v1455_v61, %v1454_v58 }
 0x259   : > { %v1436_v14 = vrot.slane %v1435_v62, 1  ;;  %v1498_v37 = vadd.f32 %v1497_v63, %v1496_v11 }
 0x25a   : > { %v1478_v4 = vrot.slane %v1477_v0, 1  ;;  %v1457_v5 = vrot.slane %v1456_v15, 1 }
 0x25b   : > { %v1437_v18 = vadd.f32 %v1436_v14, %v1435_v62  ;;  %v1499_v26 = vrot.slane %v1498_v37, 1 }
 0x25c   : > { %v1479_v20 = vadd.f32 %v1478_v4, %v1477_v0  ;;  %v1458_v21 = vadd.f32 %v1457_v5, %v1456_v15 }
 0x25d   : > { %v1511_v22 = vadd.f32 %v1510_v17, %v1437_v18  ;;  %v1500_v23 = vadd.f32 %v1499_v26, %v1498_v37 }
 0x25e   : > { %v1513_v1 = vadd.f32 %v1510_v17, %v1479_v20  ;;  %v1512_v24 = vadd.f32 %v1510_v17, %v1458_v21 }
 0x25f   : > { %v1692_v42 = vmul.f32 -1.442695, %v1511_v22  ;;  %v1514_v25 = vadd.f32 %v1510_v17, %v1500_v23 }
 0x260   : > { %v1694_v27 = vmul.f32 -1.442695, %v1513_v1  ;;  %v1693_v28 = vmul.f32 -1.442695, %v1512_v24 }
 0x261   : > { %1765 = vpow2.f32 %v1692_v42  ;;  %v1695_v10 = vmul.f32 -1.442695, %v1514_v25 }
 0x262   : > { %1767 = vpow2.f32 %v1694_v27 }
 0x263   : > { %1769 = vpow2.f32 %v1693_v28 }
 0x264   : > { %1771 = vpow2.f32 %v1695_v10 }
 0x26b   : > { %v1766_v29 = vpop.eup %1765 }
 0x26c   : > { %v1768_v16 = vpop.eup %1767  ;;  %v1527_v30 = vadd.f32 1.0, %v1766_v29 }
 0x26d   : > { %v1770_v32 = vpop.eup %1769  ;;  %v1529_v33 = vadd.f32 1.0, %v1768_v16 }
 0x26e   : > { %v1772_v3 = vpop.eup %1771  ;;  %1773 = vrcp.f32 %v1527_v30  ;;  %v1528_v34 = vadd.f32 1.0, %v1770_v32 }
 0x26f   : > { %1775 = vrcp.f32 %v1529_v33  ;;  %v1530_v13 = vadd.f32 1.0, %v1772_v3 }
 0x270   : > { %1777 = vrcp.f32 %v1528_v34 }
 0x271   : > { %1779 = vrcp.f32 %v1530_v13 }
 0x278   : > { %v1774_v39 = vpop.eup %1773 }
 0x279   : > { %v1776_v40 = vpop.eup %1775 }
 0x27a   : > { %v1778_v8 = vpop.eup %1777 }
 0x27b   : > { %v1780_v41 = vpop.eup %1779  ;;  %v1543_v43 = vcombine.low %v1774_v39, %v1778_v8 }
 0x27c   : > { %v1544_v44 = vcombine.low %v1776_v40, %v1780_v41 }
 0x27d   : > { %v1551_v45 = vrot.slane %v1543_v43, %v1550_v12 }
 0x27e   : > { %v1558_v7 = vrot.slane %v1544_v44, %v1550_v12 }
 0x280   : > { %v1559_v38 = vcombine.low %v1551_v45, %v1558_v7 }
 0x282   : > { %v1566_v47 = vrot.slane %v1559_v38, %v1550_v12 }
 0x284   : > { %1572 = vst.msk [vmem:[%s274_s15] sm:$0xf] %vm1570_vm2, %v1566_v47 }
 0x285   : > { %1794 = shalt.err (!%p1791_p3)
}
 0x286   : > { %s1795_s24 = scalar_lea.hbm %s2318_s19, 64  ;;  %s1799_s9 = scalar_lea.hbm %s2367_s7, 128 }
 0x287   : > { %p1796_p4 = scmp.ne.s32.totalorder %s2318_s19, %s1795_s24  ;;  %p1800_p9 = scmp.lt.u32.totalorder %s2318_s19, %s2367_s7 }
 0x288   : > { %p1801_p10 = scmp.lt.u32.totalorder %s1799_s9, %s1795_s24  ;;  %p1803_p12 = scmp.lt.u32.totalorder %s1795_s24, %s2318_s19 }
 0x289   : > { %p1797_p7 = pnand %p1796_p4, %p1929_p5 }
 0x28a   : > { %p1802_p11 = por %p1801_p10, %p1800_p9 }
 0x28b   : > { %p1798_p8 = pneg %p1797_p7 }
 0x28c   : > { %p1804_p13 = por %p1803_p12, %p1802_p11 }
 0x28e   : > { %p1805_p0 = pnand %p1804_p13, %p1798_p8 }
 0x290   : > { %1808 = shalt.err (!%p1805_p0)
}
 0x291   : > { %1702 = dma.vmem_to_hbm [thread:$0]  (%p1929_p5), %s2320_s16, 64, %s2318_s19, %s1574_s20  }
 0x292 PF: > { %p1708_p1 = scmp.ge.s32.totalorder %s1843_s29, 2  ;;  %s1600_s15 = sand.u32 1, %s1831_s26  }
 0x293   : > { %s1601_s17 = scalar_lea.sflag [#allocation4], %s1600_s15 }
 0x294   : > { %p1705_p2 = pnand %p1708_p1, %p1933_p6 }
 0x296   : > { %1826 = dma.done.wait (!%p1705_p2), %s1601_s17, 64  }
 0x297   : > { %1828 = vsyncadd (!%p1705_p2), %s1601_s17, 4294967232  ;;  %p19_p3 = scmp.ge.s32.totalorder %s1916_s8, 4   ;;  %s2370_s26 = smov %s1835_s27 }
 0x298   : > { %s2371_s27 = smov %s1839_s28  ;;  %s2372_s28 = smov %s1927_s11 }
 0x299   : > { %s2373_s29 = smov %s1916_s8  ;;  %21 = sbr.rel (!%p19_p3) target bundleno = 6 (0x6), region = 83 }
 0x2a0   :  { %1606 = vsyncpa [#allocation4], 1 }
 0x2a1   :  { %1608 = vsyncpa [#allocation4 + $0x1], 1 }

</bundles_post_ra>
